<compile_context>
chip_gen: v7x
topology: tpu7x:2x2x1
jax: 0.10.0
libtpu: 0.0.40
codegen_flags: <defaults>
</compile_context>

<pallas_src>
import math

import jax
import jax.numpy as jnp
import numpy as np
from jax.experimental import pallas as pl
from jax.experimental.pallas import tpu as pltpu


def _make_kernel(Bb, S, E, H):
    Dh = E // H
    scale = 1.0 / math.sqrt(Dh)

    def kernel(x_ref,
               wq_ref, wk_ref, wv_ref, bq_ref, bk_ref, bv_ref,
               wo_ref, bo_ref, wm_ref, bm_ref, lnw_ref, lnb_ref,
               wf_ref, bf_ref,
               final_ref,
               h_ref):
        l = pl.program_id(1)

        # Initialize the carried hidden state (VMEM scratch) from the input at layer 0.
        @pl.when(l == 0)
        def _():
            h_ref[...] = x_ref[...]

        x = h_ref[...]                           # (Bb, S, E) f32 hidden state
        x2 = x.reshape(Bb * S, E)
        xb = x2.astype(jnp.bfloat16)             # bf16 activations for MXU matmuls

        # ---- MultiheadAttention, per head (no lane slicing, no concat) ----
        attn = jnp.zeros((Bb * S, E), jnp.float32)
        for h in range(H):                       # static unroll, H is small
            q = (jnp.dot(xb, wq_ref[h], preferred_element_type=jnp.float32)
                 + bq_ref[h]).reshape(Bb, S, Dh)
            k = (jnp.dot(xb, wk_ref[h], preferred_element_type=jnp.float32)
                 + bk_ref[h]).reshape(Bb, S, Dh)
            v = (jnp.dot(xb, wv_ref[h], preferred_element_type=jnp.float32)
                 + bv_ref[h]).reshape(Bb, S, Dh)

            s = jnp.einsum('bqd,bkd->bqk',
                           q.astype(jnp.bfloat16), k.astype(jnp.bfloat16),
                           preferred_element_type=jnp.float32) * scale
            s = s - jnp.max(s, axis=-1, keepdims=True)
            p = jnp.exp(s)
            p = p * pl.reciprocal(jnp.sum(p, axis=-1, keepdims=True), approx=True)

            ctx = jnp.einsum('bqk,bkd->bqd',
                             p.astype(jnp.bfloat16), v.astype(jnp.bfloat16),
                             preferred_element_type=jnp.float32)
            # Accumulate the out-projection per head (wo_ref[h] is (Dh, E)).
            attn = attn + jnp.dot(ctx.reshape(Bb * S, Dh).astype(jnp.bfloat16),
                                  wo_ref[h], preferred_element_type=jnp.float32)
        attn = attn + bo_ref[...]                # (1, E) bias broadcast

        # ---- MLP: Linear(E, E) + Dropout (identity in eval) ----
        mlp = jnp.dot(attn.astype(jnp.bfloat16), wm_ref[...],
                      preferred_element_type=jnp.float32) + bm_ref[...]

        # ---- residual + LayerNorm (eps = 1e-5, PyTorch default) ----
        x_new = x2 + mlp
        mean = jnp.mean(x_new, axis=-1, keepdims=True)
        cent = x_new - mean
        var = jnp.mean(cent * cent, axis=-1, keepdims=True)
        x_ln = cent * jax.lax.rsqrt(var + 1e-5) * lnw_ref[...] + lnb_ref[...]

        h_ref[...] = x_ln.reshape(Bb, S, E)

        # ---- final Linear(E, 1) on the first token, only at the last layer.
        # Width-1 matmul would waste the MXU: do a broadcast-multiply + lane reduction.
        @pl.when(l == pl.num_programs(1) - 1)
        def _():
            cls = x_ln.reshape(Bb, S, E)[:, 0, :]                         # (Bb, E)
            final = jnp.sum(cls * wf_ref[...], axis=-1, keepdims=True)    # (Bb, 1)
            final_ref[...] = (final + bf_ref[...]).reshape(Bb, 1, 1)

    return kernel


def attention_aggregator(x, torch_params, num_heads, batch_block=None):
    """x: (B, S, E) f32.  torch_params in PyTorch layout (weights are (out, in))."""
    (in_w, in_b, out_w, out_b, mlp_w, mlp_b, ln_w, ln_b, fin_w, fin_b) = torch_params
    L = in_w.shape[0]
    B, S, E = x.shape
    H = num_heads
    Dh = E // H
    Bb = batch_block or B
    assert B % Bb == 0 and E % H == 0

    # --- convert PyTorch-layout params to kernel layout ---------------------------------
    # PyTorch Linear: y = x @ W.T + b with W (out, in).  We pre-transpose to (in, out) and
    # split q/k/v and heads in the wrapper so the kernel never slices along the lane axis.
    def to_head_in_out(w):                      # w: (L, E_out, E_in) -> (L, H, E_in, Dh)
        wt = jnp.transpose(w, (0, 2, 1))        # (L, E_in, E_out)
        return jnp.transpose(wt.reshape(L, E, H, Dh), (0, 2, 1, 3)).astype(jnp.bfloat16)

    wq_h = to_head_in_out(in_w[:, 0 * E:1 * E, :])
    wk_h = to_head_in_out(in_w[:, 1 * E:2 * E, :])
    wv_h = to_head_in_out(in_w[:, 2 * E:3 * E, :])
    bq_h = in_b[:, 0 * E:1 * E].reshape(L, H, 1, Dh).astype(jnp.float32)
    bk_h = in_b[:, 1 * E:2 * E].reshape(L, H, 1, Dh).astype(jnp.float32)
    bv_h = in_b[:, 2 * E:3 * E].reshape(L, H, 1, Dh).astype(jnp.float32)

    wo_h = jnp.transpose(out_w, (0, 2, 1)).reshape(L, H, Dh, E).astype(jnp.bfloat16)
    bo2 = out_b.reshape(L, 1, E).astype(jnp.float32)
    wm_t = jnp.transpose(mlp_w, (0, 2, 1)).astype(jnp.bfloat16)
    bm2 = mlp_b.reshape(L, 1, E).astype(jnp.float32)
    lnw2 = ln_w.reshape(L, 1, E).astype(jnp.float32)
    lnb2 = ln_b.reshape(L, 1, E).astype(jnp.float32)
    wf2 = fin_w.reshape(1, E).astype(jnp.float32)                    # (1, E), used as row
    bf2 = fin_b.reshape(1, 1).astype(jnp.float32)

    kernel = _make_kernel(Bb, S, E, H)

    grid_spec = pltpu.PrefetchScalarGridSpec(
        num_scalar_prefetch=0,
        grid=(B // Bb, L),                       # batch (parallel) outer, layer (arbitrary) inner
        in_specs=[
            pl.BlockSpec((Bb, S, E), lambda b, l: (b, 0, 0)),            # x (fetched once per b)
            pl.BlockSpec((None, H, E, Dh), lambda b, l: (l, 0, 0, 0)),   # wq  (per-head, bf16)
            pl.BlockSpec((None, H, E, Dh), lambda b, l: (l, 0, 0, 0)),   # wk
            pl.BlockSpec((None, H, E, Dh), lambda b, l: (l, 0, 0, 0)),   # wv
            pl.BlockSpec((None, H, 1, Dh), lambda b, l: (l, 0, 0, 0)),   # bq
            pl.BlockSpec((None, H, 1, Dh), lambda b, l: (l, 0, 0, 0)),   # bk
            pl.BlockSpec((None, H, 1, Dh), lambda b, l: (l, 0, 0, 0)),   # bv
            pl.BlockSpec((None, H, Dh, E), lambda b, l: (l, 0, 0, 0)),   # wo (per-head, bf16)
            pl.BlockSpec((None, 1, E), lambda b, l: (l, 0, 0)),          # bo
            pl.BlockSpec((None, E, E), lambda b, l: (l, 0, 0)),          # mlp weight (bf16)
            pl.BlockSpec((None, 1, E), lambda b, l: (l, 0, 0)),          # mlp bias
            pl.BlockSpec((None, 1, E), lambda b, l: (l, 0, 0)),          # layernorm weight
            pl.BlockSpec((None, 1, E), lambda b, l: (l, 0, 0)),          # layernorm bias
            pl.BlockSpec((1, E), lambda b, l: (0, 0)),                   # final weight row
            pl.BlockSpec((1, 1), lambda b, l: (0, 0)),                   # final bias
        ],
        out_specs=pl.BlockSpec((Bb, 1, 1), lambda b, l: (b, 0, 0)),      # final output only
        scratch_shapes=[pltpu.VMEM((Bb, S, E), jnp.float32)],            # carried hidden state
    )

    final = pl.pallas_call(
        kernel,
        grid_spec=grid_spec,
        out_shape=jax.ShapeDtypeStruct((B, 1, 1), jnp.float32),
        compiler_params=pltpu.CompilerParams(
            dimension_semantics=("parallel", "arbitrary"),
            vmem_limit_bytes=32 * 1024 * 1024,   # above v5e's 16 MiB default, safe on v6e/v7x
        ),
    )(x.astype(jnp.float32),
      wq_h, wk_h, wv_h, bq_h, bk_h, bv_h,
      wo_h, bo2, wm_t, bm2, lnw2, lnb2, wf2, bf2)
    return final


def reference(x, torch_params, num_heads):
    """Pure-JAX f32 reference matching the PyTorch forward (eval mode)."""
    (in_w, in_b, out_w, out_b, mlp_w, mlp_b, ln_w, ln_b, fin_w, fin_b) = torch_params
    L = in_w.shape[0]
    B, S, E = x.shape
    H = num_heads
    Dh = E // H
    scale = 1.0 / math.sqrt(Dh)
    for l in range(L):
        qkv = x @ in_w[l].T + in_b[l]
        q, k, v = jnp.split(qkv, 3, axis=-1)
        q = q.reshape(B, S, H, Dh).transpose(0, 2, 1, 3)
        k = k.reshape(B, S, H, Dh).transpose(0, 2, 1, 3)
        v = v.reshape(B, S, H, Dh).transpose(0, 2, 1, 3)
        s = jnp.einsum('bhqd,bhkd->bhqk', q, k) * scale
        p = jax.nn.softmax(s, axis=-1)
        ctx = jnp.einsum('bhqk,bhkd->bhqd', p, v).transpose(0, 2, 1, 3).reshape(B, S, E)
        attn = ctx @ out_w[l].T + out_b[l]
        mlp = attn @ mlp_w[l].T + mlp_b[l]       # dropout = identity (eval)
        xn = x + mlp
        mean = xn.mean(-1, keepdims=True)
        var = ((xn - mean) ** 2).mean(-1, keepdims=True)
        x = (xn - mean) / jnp.sqrt(var + 1e-5) * ln_w[l] + ln_b[l]
    return x[:, :1, :] @ fin_w.T + fin_b


if __name__ == "__main__":
    # Small shapes: batch=2, seq=8, embed_dim=32, num_heads=4, num_layers=3
    B, S, E, H, L = 2, 8, 32, 4, 3
    key = jax.random.PRNGKey(0)
    ks = jax.random.split(key, 9)

    def init(k, shape, scale=0.1):
        return (jax.random.normal(k, shape, jnp.float32) * scale).astype(jnp.float32)

    x = jax.random.normal(ks[0], (B, S, E), jnp.float32)

    # Parameters in PyTorch layout (weights are (out_features, in_features)).
    in_w = init(ks[1], (L, 3 * E, E))        # MultiheadAttention packed in_proj_weight
    in_b = init(ks[2], (L, 3 * E))           # in_proj_bias
    out_w = init(ks[3], (L, E, E))           # out_proj.weight
    out_b = init(ks[4], (L, E))              # out_proj.bias
    mlp_w = init(ks[5], (L, E, E))           # MLP Linear(E, E).weight
    mlp_b = init(ks[6], (L, E))              # MLP Linear(E, E).bias
    ln_w = jnp.ones((L, E), jnp.float32)     # LayerNorm weight
    ln_b = jnp.zeros((L, E), jnp.float32)    # LayerNorm bias
    fin_w = init(ks[7], (1, E))              # final Linear(E, 1).weight
    fin_b = init(ks[8], (1,))                # final Linear(E, 1).bias
    params = (in_w, in_b, out_w, out_b, mlp_w, mlp_b, ln_w, ln_b, fin_w, fin_b)

    out = attention_aggregator(x, params, num_heads=H, batch_block=1)
    out = jax.block_until_ready(out)
    assert out.shape == (B, 1, 1)

    with jax.default_matmul_precision("highest"):
        ref = reference(x, params, H)
    np.testing.assert_allclose(np.asarray(out), np.asarray(ref), rtol=2e-2, atol=2e-2)

    print("KERNEL_OK")
</pallas_src>

<mosaic_0001>
module attributes {stable_mosaic.version = 11 : i64} {
  func.func @kernel(%arg0: i32, %arg1: i32, %arg2: memref<1x8x32xf32, #tpu.memory_space<vmem>>, %arg3: memref<1x4x32x8xbf16, #tpu.memory_space<vmem>>, %arg4: memref<1x4x32x8xbf16, #tpu.memory_space<vmem>>, %arg5: memref<1x4x32x8xbf16, #tpu.memory_space<vmem>>, %arg6: memref<1x4x1x8xf32, #tpu.memory_space<vmem>>, %arg7: memref<1x4x1x8xf32, #tpu.memory_space<vmem>>, %arg8: memref<1x4x1x8xf32, #tpu.memory_space<vmem>>, %arg9: memref<1x4x8x32xbf16, #tpu.memory_space<vmem>>, %arg10: memref<1x1x32xf32, #tpu.memory_space<vmem>>, %arg11: memref<1x32x32xbf16, #tpu.memory_space<vmem>>, %arg12: memref<1x1x32xf32, #tpu.memory_space<vmem>>, %arg13: memref<1x1x32xf32, #tpu.memory_space<vmem>>, %arg14: memref<1x1x32xf32, #tpu.memory_space<vmem>>, %arg15: memref<1x32xf32, #tpu.memory_space<vmem>>, %arg16: memref<1x1xf32, #tpu.memory_space<vmem>>, %arg17: memref<1x1x1xf32, #tpu.memory_space<vmem>>, %arg18: memref<1x8x32xf32, #tpu.memory_space<vmem>>) attributes {dimension_semantics = [#tpu.dimension_semantics<parallel>, #tpu.dimension_semantics<arbitrary>], iteration_bounds = array<i64: 2, 3>, scalar_prefetch = 0 : i64, scratch_operands = 1 : i64, tpu.core_type = #tpu.core_type<tc>, window_params = [{transform_indices = @transform_0, window_bounds = array<i64: 1, 8, 32>}, {transform_indices = @transform_1, window_bounds = array<i64: 1, 4, 32, 8>}, {transform_indices = @transform_2, window_bounds = array<i64: 1, 4, 32, 8>}, {transform_indices = @transform_3, window_bounds = array<i64: 1, 4, 32, 8>}, {transform_indices = @transform_4, window_bounds = array<i64: 1, 4, 1, 8>}, {transform_indices = @transform_5, window_bounds = array<i64: 1, 4, 1, 8>}, {transform_indices = @transform_6, window_bounds = array<i64: 1, 4, 1, 8>}, {transform_indices = @transform_7, window_bounds = array<i64: 1, 4, 8, 32>}, {transform_indices = @transform_8, window_bounds = array<i64: 1, 1, 32>}, {transform_indices = @transform_9, window_bounds = array<i64: 1, 32, 32>}, {transform_indices = @transform_10, window_bounds = array<i64: 1, 1, 32>}, {transform_indices = @transform_11, window_bounds = array<i64: 1, 1, 32>}, {transform_indices = @transform_12, window_bounds = array<i64: 1, 1, 32>}, {pipeline_mode = #tpu.pipeline_mode<synchronous>, transform_indices = @transform_13, window_bounds = array<i64: 1, 32>}, {pipeline_mode = #tpu.pipeline_mode<synchronous>, transform_indices = @transform_14, window_bounds = array<i64: 1, 1>}, {transform_indices = @transform_15, window_bounds = array<i64: 1, 1, 1>}]} {
    %c0_i32 = arith.constant 0 : i32
    %0 = arith.cmpi eq, %arg1, %c0_i32 : i32
    %1 = arith.extui %0 : i1 to i32
    %c0_i32_0 = arith.constant 0 : i32
    %2 = arith.cmpi ne, %1, %c0_i32_0 : i32
    scf.if %2 {
      %c0_173 = arith.constant 0 : index
      %c0_174 = arith.constant 0 : index
      %c0_175 = arith.constant 0 : index
      %241 = vector.load %arg2[%c0_173, %c0_174, %c0_175] : memref<1x8x32xf32, #tpu.memory_space<vmem>>, vector<1x8x32xf32>
      %c0_176 = arith.constant 0 : index
      %c0_177 = arith.constant 0 : index
      %c0_178 = arith.constant 0 : index
      %242 = vector.load %arg18[%c0_176, %c0_177, %c0_178] : memref<1x8x32xf32, #tpu.memory_space<vmem>>, vector<1x8x32xf32>
      tpu.vector_store %arg18[%c0_176, %c0_177, %c0_178], %241 {strides = array<i32>} : memref<1x8x32xf32, #tpu.memory_space<vmem>>, vector<1x8x32xf32>,
    } else {
    }
    %c0 = arith.constant 0 : index
    %c0_1 = arith.constant 0 : index
    %c0_2 = arith.constant 0 : index
    %3 = vector.load %arg18[%c0, %c0_1, %c0_2] : memref<1x8x32xf32, #tpu.memory_space<vmem>>, vector<1x8x32xf32>
    %4 = vector.shape_cast %3 : vector<1x8x32xf32> to vector<8x32xf32>
    %5 = arith.truncf %4 : vector<8x32xf32> to vector<8x32xbf16>
    %cst = arith.constant 0.000000e+00 : f32
    %6 = vector.broadcast %cst : f32 to vector<8x32xf32>
    %c0_3 = arith.constant 0 : index
    %c0_4 = arith.constant 0 : index
    %c0_5 = arith.constant 0 : index
    %c0_6 = arith.constant 0 : index
    %7 = vector.load %arg3[%c0_3, %c0_4, %c0_5, %c0_6] : memref<1x4x32x8xbf16, #tpu.memory_space<vmem>>, vector<1x1x32x8xbf16>
    %8 = vector.shape_cast %7 : vector<1x1x32x8xbf16> to vector<32x8xbf16>
    %cst_7 = arith.constant dense<0.000000e+00> : vector<8x8xf32>
    %9 = tpu.matmul %5, %8, %cst_7 {dimension_numbers = #tpu.dot_dimension_numbers<[1], [0], [0], [1], [0, 0, 1, 1], [], []>} : vector<8x32xbf16>, vector<32x8xbf16>, vector<8x8xf32> -> vector<8x8xf32>
    %c0_8 = arith.constant 0 : index
    %c0_9 = arith.constant 0 : index
    %c0_10 = arith.constant 0 : index
    %c0_11 = arith.constant 0 : index
    %10 = vector.load %arg6[%c0_8, %c0_9, %c0_10, %c0_11] : memref<1x4x1x8xf32, #tpu.memory_space<vmem>>, vector<1x1x1x8xf32>
    %11 = vector.shape_cast %10 : vector<1x1x1x8xf32> to vector<1x8xf32>
    %12 = vector.broadcast %11 : vector<1x8xf32> to vector<8x8xf32>
    %13 = arith.addf %9, %12 : vector<8x8xf32>
    %14 = vector.shape_cast %13 : vector<8x8xf32> to vector<1x8x8xf32>
    %c0_12 = arith.constant 0 : index
    %c0_13 = arith.constant 0 : index
    %c0_14 = arith.constant 0 : index
    %c0_15 = arith.constant 0 : index
    %15 = vector.load %arg4[%c0_12, %c0_13, %c0_14, %c0_15] : memref<1x4x32x8xbf16, #tpu.memory_space<vmem>>, vector<1x1x32x8xbf16>
    %16 = vector.shape_cast %15 : vector<1x1x32x8xbf16> to vector<32x8xbf16>
    %cst_16 = arith.constant dense<0.000000e+00> : vector<8x8xf32>
    %17 = tpu.matmul %5, %16, %cst_16 {dimension_numbers = #tpu.dot_dimension_numbers<[1], [0], [0], [1], [0, 0, 1, 1], [], []>} : vector<8x32xbf16>, vector<32x8xbf16>, vector<8x8xf32> -> vector<8x8xf32>
    %c0_17 = arith.constant 0 : index
    %c0_18 = arith.constant 0 : index
    %c0_19 = arith.constant 0 : index
    %c0_20 = arith.constant 0 : index
    %18 = vector.load %arg7[%c0_17, %c0_18, %c0_19, %c0_20] : memref<1x4x1x8xf32, #tpu.memory_space<vmem>>, vector<1x1x1x8xf32>
    %19 = vector.shape_cast %18 : vector<1x1x1x8xf32> to vector<1x8xf32>
    %20 = vector.broadcast %19 : vector<1x8xf32> to vector<8x8xf32>
    %21 = arith.addf %17, %20 : vector<8x8xf32>
    %22 = vector.shape_cast %21 : vector<8x8xf32> to vector<1x8x8xf32>
    %c0_21 = arith.constant 0 : index
    %c0_22 = arith.constant 0 : index
    %c0_23 = arith.constant 0 : index
    %c0_24 = arith.constant 0 : index
    %23 = vector.load %arg5[%c0_21, %c0_22, %c0_23, %c0_24] : memref<1x4x32x8xbf16, #tpu.memory_space<vmem>>, vector<1x1x32x8xbf16>
    %24 = vector.shape_cast %23 : vector<1x1x32x8xbf16> to vector<32x8xbf16>
    %cst_25 = arith.constant dense<0.000000e+00> : vector<8x8xf32>
    %25 = tpu.matmul %5, %24, %cst_25 {dimension_numbers = #tpu.dot_dimension_numbers<[1], [0], [0], [1], [0, 0, 1, 1], [], []>} : vector<8x32xbf16>, vector<32x8xbf16>, vector<8x8xf32> -> vector<8x8xf32>
    %c0_26 = arith.constant 0 : index
    %c0_27 = arith.constant 0 : index
    %c0_28 = arith.constant 0 : index
    %c0_29 = arith.constant 0 : index
    %26 = vector.load %arg8[%c0_26, %c0_27, %c0_28, %c0_29] : memref<1x4x1x8xf32, #tpu.memory_space<vmem>>, vector<1x1x1x8xf32>
    %27 = vector.shape_cast %26 : vector<1x1x1x8xf32> to vector<1x8xf32>
    %28 = vector.broadcast %27 : vector<1x8xf32> to vector<8x8xf32>
    %29 = arith.addf %25, %28 : vector<8x8xf32>
    %30 = vector.shape_cast %29 : vector<8x8xf32> to vector<1x8x8xf32>
    %31 = arith.truncf %14 : vector<1x8x8xf32> to vector<1x8x8xbf16>
    %32 = arith.truncf %22 : vector<1x8x8xf32> to vector<1x8x8xbf16>
    "tpu.trace_start"() <{level = 10 : i32, message = "bqd,bkd->bqk"}> : () -> ()
    %cst_30 = arith.constant dense<0.000000e+00> : vector<1x8x8xf32>
    %33 = tpu.matmul %31, %32, %cst_30 {dimension_numbers = #tpu.dot_dimension_numbers<[2], [2], [1], [1], [0, 0, 0, 1, 1, 1], [0], [0]>} : vector<1x8x8xbf16>, vector<1x8x8xbf16>, vector<1x8x8xf32> -> vector<1x8x8xf32>
    "tpu.trace_stop"() : () -> ()
    %cst_31 = arith.constant 0.353553385 : f32
    %34 = vector.broadcast %cst_31 : f32 to vector<1x8x8xf32>
    %35 = arith.mulf %33, %34 : vector<1x8x8xf32>
    %cst_32 = arith.constant dense<0xFF800000> : vector<1x8xf32>
    %36 = vector.multi_reduction <maximumf>, %35, %cst_32 [2] : vector<1x8x8xf32> to vector<1x8xf32>
    %37 = vector.shape_cast %36 : vector<1x8xf32> to vector<1x8x1xf32>
    %38 = vector.broadcast %37 : vector<1x8x1xf32> to vector<1x8x8xf32>
    %39 = arith.subf %35, %38 : vector<1x8x8xf32>
    %40 = math.exp %39 : vector<1x8x8xf32>
    %cst_33 = arith.constant dense<0.000000e+00> : vector<1x8xf32>
    %41 = vector.multi_reduction <add>, %40, %cst_33 [2] : vector<1x8x8xf32> to vector<1x8xf32>
    %42 = vector.shape_cast %41 : vector<1x8xf32> to vector<1x8x1xf32>
    %43 = tpu.reciprocal %42 {approx = true} : vector<1x8x1xf32> -> vector<1x8x1xf32>
    %44 = vector.broadcast %43 : vector<1x8x1xf32> to vector<1x8x8xf32>
    %45 = arith.mulf %40, %44 : vector<1x8x8xf32>
    %46 = arith.truncf %45 : vector<1x8x8xf32> to vector<1x8x8xbf16>
    %47 = arith.truncf %30 : vector<1x8x8xf32> to vector<1x8x8xbf16>
    "tpu.trace_start"() <{level = 10 : i32, message = "bqk,bkd->bqd"}> : () -> ()
    %cst_34 = arith.constant dense<0.000000e+00> : vector<1x8x8xf32>
    %48 = tpu.matmul %46, %47, %cst_34 {dimension_numbers = #tpu.dot_dimension_numbers<[2], [1], [1], [2], [0, 0, 0, 1, 1, 2], [0], [0]>} : vector<1x8x8xbf16>, vector<1x8x8xbf16>, vector<1x8x8xf32> -> vector<1x8x8xf32>
    "tpu.trace_stop"() : () -> ()
    %49 = vector.shape_cast %48 : vector<1x8x8xf32> to vector<8x8xf32>
    %50 = arith.truncf %49 : vector<8x8xf32> to vector<8x8xbf16>
    %c0_35 = arith.constant 0 : index
    %c0_36 = arith.constant 0 : index
    %c0_37 = arith.constant 0 : index
    %c0_38 = arith.constant 0 : index
    %51 = vector.load %arg9[%c0_35, %c0_36, %c0_37, %c0_38] : memref<1x4x8x32xbf16, #tpu.memory_space<vmem>>, vector<1x1x8x32xbf16>
    %52 = vector.shape_cast %51 : vector<1x1x8x32xbf16> to vector<8x32xbf16>
    %cst_39 = arith.constant dense<0.000000e+00> : vector<8x32xf32>
    %53 = tpu.matmul %50, %52, %cst_39 {dimension_numbers = #tpu.dot_dimension_numbers<[1], [0], [0], [1], [0, 0, 1, 1], [], []>} : vector<8x8xbf16>, vector<8x32xbf16>, vector<8x32xf32> -> vector<8x32xf32>
    %54 = arith.addf %6, %53 : vector<8x32xf32>
    %c0_40 = arith.constant 0 : index
    %c1 = arith.constant 1 : index
    %c0_41 = arith.constant 0 : index
    %c0_42 = arith.constant 0 : index
    %55 = vector.load %arg3[%c0_40, %c1, %c0_41, %c0_42] : memref<1x4x32x8xbf16, #tpu.memory_space<vmem>>, vector<1x1x32x8xbf16>
    %56 = vector.shape_cast %55 : vector<1x1x32x8xbf16> to vector<32x8xbf16>
    %cst_43 = arith.constant dense<0.000000e+00> : vector<8x8xf32>
    %57 = tpu.matmul %5, %56, %cst_43 {dimension_numbers = #tpu.dot_dimension_numbers<[1], [0], [0], [1], [0, 0, 1, 1], [], []>} : vector<8x32xbf16>, vector<32x8xbf16>, vector<8x8xf32> -> vector<8x8xf32>
    %c0_44 = arith.constant 0 : index
    %c1_45 = arith.constant 1 : index
    %c0_46 = arith.constant 0 : index
    %c0_47 = arith.constant 0 : index
    %58 = vector.load %arg6[%c0_44, %c1_45, %c0_46, %c0_47] : memref<1x4x1x8xf32, #tpu.memory_space<vmem>>, vector<1x1x1x8xf32>
    %59 = vector.shape_cast %58 : vector<1x1x1x8xf32> to vector<1x8xf32>
    %60 = vector.broadcast %59 : vector<1x8xf32> to vector<8x8xf32>
    %61 = arith.addf %57, %60 : vector<8x8xf32>
    %62 = vector.shape_cast %61 : vector<8x8xf32> to vector<1x8x8xf32>
    %c0_48 = arith.constant 0 : index
    %c1_49 = arith.constant 1 : index
    %c0_50 = arith.constant 0 : index
    %c0_51 = arith.constant 0 : index
    %63 = vector.load %arg4[%c0_48, %c1_49, %c0_50, %c0_51] : memref<1x4x32x8xbf16, #tpu.memory_space<vmem>>, vector<1x1x32x8xbf16>
    %64 = vector.shape_cast %63 : vector<1x1x32x8xbf16> to vector<32x8xbf16>
    %cst_52 = arith.constant dense<0.000000e+00> : vector<8x8xf32>
    %65 = tpu.matmul %5, %64, %cst_52 {dimension_numbers = #tpu.dot_dimension_numbers<[1], [0], [0], [1], [0, 0, 1, 1], [], []>} : vector<8x32xbf16>, vector<32x8xbf16>, vector<8x8xf32> -> vector<8x8xf32>
    %c0_53 = arith.constant 0 : index
    %c1_54 = arith.constant 1 : index
    %c0_55 = arith.constant 0 : index
    %c0_56 = arith.constant 0 : index
    %66 = vector.load %arg7[%c0_53, %c1_54, %c0_55, %c0_56] : memref<1x4x1x8xf32, #tpu.memory_space<vmem>>, vector<1x1x1x8xf32>
    %67 = vector.shape_cast %66 : vector<1x1x1x8xf32> to vector<1x8xf32>
    %68 = vector.broadcast %67 : vector<1x8xf32> to vector<8x8xf32>
    %69 = arith.addf %65, %68 : vector<8x8xf32>
    %70 = vector.shape_cast %69 : vector<8x8xf32> to vector<1x8x8xf32>
    %c0_57 = arith.constant 0 : index
    %c1_58 = arith.constant 1 : index
    %c0_59 = arith.constant 0 : index
    %c0_60 = arith.constant 0 : index
    %71 = vector.load %arg5[%c0_57, %c1_58, %c0_59, %c0_60] : memref<1x4x32x8xbf16, #tpu.memory_space<vmem>>, vector<1x1x32x8xbf16>
    %72 = vector.shape_cast %71 : vector<1x1x32x8xbf16> to vector<32x8xbf16>
    %cst_61 = arith.constant dense<0.000000e+00> : vector<8x8xf32>
    %73 = tpu.matmul %5, %72, %cst_61 {dimension_numbers = #tpu.dot_dimension_numbers<[1], [0], [0], [1], [0, 0, 1, 1], [], []>} : vector<8x32xbf16>, vector<32x8xbf16>, vector<8x8xf32> -> vector<8x8xf32>
    %c0_62 = arith.constant 0 : index
    %c1_63 = arith.constant 1 : index
    %c0_64 = arith.constant 0 : index
    %c0_65 = arith.constant 0 : index
    %74 = vector.load %arg8[%c0_62, %c1_63, %c0_64, %c0_65] : memref<1x4x1x8xf32, #tpu.memory_space<vmem>>, vector<1x1x1x8xf32>
    %75 = vector.shape_cast %74 : vector<1x1x1x8xf32> to vector<1x8xf32>
    %76 = vector.broadcast %75 : vector<1x8xf32> to vector<8x8xf32>
    %77 = arith.addf %73, %76 : vector<8x8xf32>
    %78 = vector.shape_cast %77 : vector<8x8xf32> to vector<1x8x8xf32>
    %79 = arith.truncf %62 : vector<1x8x8xf32> to vector<1x8x8xbf16>
    %80 = arith.truncf %70 : vector<1x8x8xf32> to vector<1x8x8xbf16>
    "tpu.trace_start"() <{level = 10 : i32, message = "bqd,bkd->bqk"}> : () -> ()
    %cst_66 = arith.constant dense<0.000000e+00> : vector<1x8x8xf32>
    %81 = tpu.matmul %79, %80, %cst_66 {dimension_numbers = #tpu.dot_dimension_numbers<[2], [2], [1], [1], [0, 0, 0, 1, 1, 1], [0], [0]>} : vector<1x8x8xbf16>, vector<1x8x8xbf16>, vector<1x8x8xf32> -> vector<1x8x8xf32>
    "tpu.trace_stop"() : () -> ()
    %cst_67 = arith.constant 0.353553385 : f32
    %82 = vector.broadcast %cst_67 : f32 to vector<1x8x8xf32>
    %83 = arith.mulf %81, %82 : vector<1x8x8xf32>
    %cst_68 = arith.constant dense<0xFF800000> : vector<1x8xf32>
    %84 = vector.multi_reduction <maximumf>, %83, %cst_68 [2] : vector<1x8x8xf32> to vector<1x8xf32>
    %85 = vector.shape_cast %84 : vector<1x8xf32> to vector<1x8x1xf32>
    %86 = vector.broadcast %85 : vector<1x8x1xf32> to vector<1x8x8xf32>
    %87 = arith.subf %83, %86 : vector<1x8x8xf32>
    %88 = math.exp %87 : vector<1x8x8xf32>
    %cst_69 = arith.constant dense<0.000000e+00> : vector<1x8xf32>
    %89 = vector.multi_reduction <add>, %88, %cst_69 [2] : vector<1x8x8xf32> to vector<1x8xf32>
    %90 = vector.shape_cast %89 : vector<1x8xf32> to vector<1x8x1xf32>
    %91 = tpu.reciprocal %90 {approx = true} : vector<1x8x1xf32> -> vector<1x8x1xf32>
    %92 = vector.broadcast %91 : vector<1x8x1xf32> to vector<1x8x8xf32>
    %93 = arith.mulf %88, %92 : vector<1x8x8xf32>
    %94 = arith.truncf %93 : vector<1x8x8xf32> to vector<1x8x8xbf16>
    %95 = arith.truncf %78 : vector<1x8x8xf32> to vector<1x8x8xbf16>
    "tpu.trace_start"() <{level = 10 : i32, message = "bqk,bkd->bqd"}> : () -> ()
    %cst_70 = arith.constant dense<0.000000e+00> : vector<1x8x8xf32>
    %96 = tpu.matmul %94, %95, %cst_70 {dimension_numbers = #tpu.dot_dimension_numbers<[2], [1], [1], [2], [0, 0, 0, 1, 1, 2], [0], [0]>} : vector<1x8x8xbf16>, vector<1x8x8xbf16>, vector<1x8x8xf32> -> vector<1x8x8xf32>
    "tpu.trace_stop"() : () -> ()
    %97 = vector.shape_cast %96 : vector<1x8x8xf32> to vector<8x8xf32>
    %98 = arith.truncf %97 : vector<8x8xf32> to vector<8x8xbf16>
    %c0_71 = arith.constant 0 : index
    %c1_72 = arith.constant 1 : index
    %c0_73 = arith.constant 0 : index
    %c0_74 = arith.constant 0 : index
    %99 = vector.load %arg9[%c0_71, %c1_72, %c0_73, %c0_74] : memref<1x4x8x32xbf16, #tpu.memory_space<vmem>>, vector<1x1x8x32xbf16>
    %100 = vector.shape_cast %99 : vector<1x1x8x32xbf16> to vector<8x32xbf16>
    %cst_75 = arith.constant dense<0.000000e+00> : vector<8x32xf32>
    %101 = tpu.matmul %98, %100, %cst_75 {dimension_numbers = #tpu.dot_dimension_numbers<[1], [0], [0], [1], [0, 0, 1, 1], [], []>} : vector<8x8xbf16>, vector<8x32xbf16>, vector<8x32xf32> -> vector<8x32xf32>
    %102 = arith.addf %54, %101 : vector<8x32xf32>
    %c0_76 = arith.constant 0 : index
    %c2 = arith.constant 2 : index
    %c0_77 = arith.constant 0 : index
    %c0_78 = arith.constant 0 : index
    %103 = vector.load %arg3[%c0_76, %c2, %c0_77, %c0_78] : memref<1x4x32x8xbf16, #tpu.memory_space<vmem>>, vector<1x1x32x8xbf16>
    %104 = vector.shape_cast %103 : vector<1x1x32x8xbf16> to vector<32x8xbf16>
    %cst_79 = arith.constant dense<0.000000e+00> : vector<8x8xf32>
    %105 = tpu.matmul %5, %104, %cst_79 {dimension_numbers = #tpu.dot_dimension_numbers<[1], [0], [0], [1], [0, 0, 1, 1], [], []>} : vector<8x32xbf16>, vector<32x8xbf16>, vector<8x8xf32> -> vector<8x8xf32>
    %c0_80 = arith.constant 0 : index
    %c2_81 = arith.constant 2 : index
    %c0_82 = arith.constant 0 : index
    %c0_83 = arith.constant 0 : index
    %106 = vector.load %arg6[%c0_80, %c2_81, %c0_82, %c0_83] : memref<1x4x1x8xf32, #tpu.memory_space<vmem>>, vector<1x1x1x8xf32>
    %107 = vector.shape_cast %106 : vector<1x1x1x8xf32> to vector<1x8xf32>
    %108 = vector.broadcast %107 : vector<1x8xf32> to vector<8x8xf32>
    %109 = arith.addf %105, %108 : vector<8x8xf32>
    %110 = vector.shape_cast %109 : vector<8x8xf32> to vector<1x8x8xf32>
    %c0_84 = arith.constant 0 : index
    %c2_85 = arith.constant 2 : index
    %c0_86 = arith.constant 0 : index
    %c0_87 = arith.constant 0 : index
    %111 = vector.load %arg4[%c0_84, %c2_85, %c0_86, %c0_87] : memref<1x4x32x8xbf16, #tpu.memory_space<vmem>>, vector<1x1x32x8xbf16>
    %112 = vector.shape_cast %111 : vector<1x1x32x8xbf16> to vector<32x8xbf16>
    %cst_88 = arith.constant dense<0.000000e+00> : vector<8x8xf32>
    %113 = tpu.matmul %5, %112, %cst_88 {dimension_numbers = #tpu.dot_dimension_numbers<[1], [0], [0], [1], [0, 0, 1, 1], [], []>} : vector<8x32xbf16>, vector<32x8xbf16>, vector<8x8xf32> -> vector<8x8xf32>
    %c0_89 = arith.constant 0 : index
    %c2_90 = arith.constant 2 : index
    %c0_91 = arith.constant 0 : index
    %c0_92 = arith.constant 0 : index
    %114 = vector.load %arg7[%c0_89, %c2_90, %c0_91, %c0_92] : memref<1x4x1x8xf32, #tpu.memory_space<vmem>>, vector<1x1x1x8xf32>
    %115 = vector.shape_cast %114 : vector<1x1x1x8xf32> to vector<1x8xf32>
    %116 = vector.broadcast %115 : vector<1x8xf32> to vector<8x8xf32>
    %117 = arith.addf %113, %116 : vector<8x8xf32>
    %118 = vector.shape_cast %117 : vector<8x8xf32> to vector<1x8x8xf32>
    %c0_93 = arith.constant 0 : index
    %c2_94 = arith.constant 2 : index
    %c0_95 = arith.constant 0 : index
    %c0_96 = arith.constant 0 : index
    %119 = vector.load %arg5[%c0_93, %c2_94, %c0_95, %c0_96] : memref<1x4x32x8xbf16, #tpu.memory_space<vmem>>, vector<1x1x32x8xbf16>
    %120 = vector.shape_cast %119 : vector<1x1x32x8xbf16> to vector<32x8xbf16>
    %cst_97 = arith.constant dense<0.000000e+00> : vector<8x8xf32>
    %121 = tpu.matmul %5, %120, %cst_97 {dimension_numbers = #tpu.dot_dimension_numbers<[1], [0], [0], [1], [0, 0, 1, 1], [], []>} : vector<8x32xbf16>, vector<32x8xbf16>, vector<8x8xf32> -> vector<8x8xf32>
    %c0_98 = arith.constant 0 : index
    %c2_99 = arith.constant 2 : index
    %c0_100 = arith.constant 0 : index
    %c0_101 = arith.constant 0 : index
    %122 = vector.load %arg8[%c0_98, %c2_99, %c0_100, %c0_101] : memref<1x4x1x8xf32, #tpu.memory_space<vmem>>, vector<1x1x1x8xf32>
    %123 = vector.shape_cast %122 : vector<1x1x1x8xf32> to vector<1x8xf32>
    %124 = vector.broadcast %123 : vector<1x8xf32> to vector<8x8xf32>
    %125 = arith.addf %121, %124 : vector<8x8xf32>
    %126 = vector.shape_cast %125 : vector<8x8xf32> to vector<1x8x8xf32>
    %127 = arith.truncf %110 : vector<1x8x8xf32> to vector<1x8x8xbf16>
    %128 = arith.truncf %118 : vector<1x8x8xf32> to vector<1x8x8xbf16>
    "tpu.trace_start"() <{level = 10 : i32, message = "bqd,bkd->bqk"}> : () -> ()
    %cst_102 = arith.constant dense<0.000000e+00> : vector<1x8x8xf32>
    %129 = tpu.matmul %127, %128, %cst_102 {dimension_numbers = #tpu.dot_dimension_numbers<[2], [2], [1], [1], [0, 0, 0, 1, 1, 1], [0], [0]>} : vector<1x8x8xbf16>, vector<1x8x8xbf16>, vector<1x8x8xf32> -> vector<1x8x8xf32>
    "tpu.trace_stop"() : () -> ()
    %cst_103 = arith.constant 0.353553385 : f32
    %130 = vector.broadcast %cst_103 : f32 to vector<1x8x8xf32>
    %131 = arith.mulf %129, %130 : vector<1x8x8xf32>
    %cst_104 = arith.constant dense<0xFF800000> : vector<1x8xf32>
    %132 = vector.multi_reduction <maximumf>, %131, %cst_104 [2] : vector<1x8x8xf32> to vector<1x8xf32>
    %133 = vector.shape_cast %132 : vector<1x8xf32> to vector<1x8x1xf32>
    %134 = vector.broadcast %133 : vector<1x8x1xf32> to vector<1x8x8xf32>
    %135 = arith.subf %131, %134 : vector<1x8x8xf32>
    %136 = math.exp %135 : vector<1x8x8xf32>
    %cst_105 = arith.constant dense<0.000000e+00> : vector<1x8xf32>
    %137 = vector.multi_reduction <add>, %136, %cst_105 [2] : vector<1x8x8xf32> to vector<1x8xf32>
    %138 = vector.shape_cast %137 : vector<1x8xf32> to vector<1x8x1xf32>
    %139 = tpu.reciprocal %138 {approx = true} : vector<1x8x1xf32> -> vector<1x8x1xf32>
    %140 = vector.broadcast %139 : vector<1x8x1xf32> to vector<1x8x8xf32>
    %141 = arith.mulf %136, %140 : vector<1x8x8xf32>
    %142 = arith.truncf %141 : vector<1x8x8xf32> to vector<1x8x8xbf16>
    %143 = arith.truncf %126 : vector<1x8x8xf32> to vector<1x8x8xbf16>
    "tpu.trace_start"() <{level = 10 : i32, message = "bqk,bkd->bqd"}> : () -> ()
    %cst_106 = arith.constant dense<0.000000e+00> : vector<1x8x8xf32>
    %144 = tpu.matmul %142, %143, %cst_106 {dimension_numbers = #tpu.dot_dimension_numbers<[2], [1], [1], [2], [0, 0, 0, 1, 1, 2], [0], [0]>} : vector<1x8x8xbf16>, vector<1x8x8xbf16>, vector<1x8x8xf32> -> vector<1x8x8xf32>
    "tpu.trace_stop"() : () -> ()
    %145 = vector.shape_cast %144 : vector<1x8x8xf32> to vector<8x8xf32>
    %146 = arith.truncf %145 : vector<8x8xf32> to vector<8x8xbf16>
    %c0_107 = arith.constant 0 : index
    %c2_108 = arith.constant 2 : index
    %c0_109 = arith.constant 0 : index
    %c0_110 = arith.constant 0 : index
    %147 = vector.load %arg9[%c0_107, %c2_108, %c0_109, %c0_110] : memref<1x4x8x32xbf16, #tpu.memory_space<vmem>>, vector<1x1x8x32xbf16>
    %148 = vector.shape_cast %147 : vector<1x1x8x32xbf16> to vector<8x32xbf16>
    %cst_111 = arith.constant dense<0.000000e+00> : vector<8x32xf32>
    %149 = tpu.matmul %146, %148, %cst_111 {dimension_numbers = #tpu.dot_dimension_numbers<[1], [0], [0], [1], [0, 0, 1, 1], [], []>} : vector<8x8xbf16>, vector<8x32xbf16>, vector<8x32xf32> -> vector<8x32xf32>
    %150 = arith.addf %102, %149 : vector<8x32xf32>
    %c0_112 = arith.constant 0 : index
    %c3 = arith.constant 3 : index
    %c0_113 = arith.constant 0 : index
    %c0_114 = arith.constant 0 : index
    %151 = vector.load %arg3[%c0_112, %c3, %c0_113, %c0_114] : memref<1x4x32x8xbf16, #tpu.memory_space<vmem>>, vector<1x1x32x8xbf16>
    %152 = vector.shape_cast %151 : vector<1x1x32x8xbf16> to vector<32x8xbf16>
    %cst_115 = arith.constant dense<0.000000e+00> : vector<8x8xf32>
    %153 = tpu.matmul %5, %152, %cst_115 {dimension_numbers = #tpu.dot_dimension_numbers<[1], [0], [0], [1], [0, 0, 1, 1], [], []>} : vector<8x32xbf16>, vector<32x8xbf16>, vector<8x8xf32> -> vector<8x8xf32>
    %c0_116 = arith.constant 0 : index
    %c3_117 = arith.constant 3 : index
    %c0_118 = arith.constant 0 : index
    %c0_119 = arith.constant 0 : index
    %154 = vector.load %arg6[%c0_116, %c3_117, %c0_118, %c0_119] : memref<1x4x1x8xf32, #tpu.memory_space<vmem>>, vector<1x1x1x8xf32>
    %155 = vector.shape_cast %154 : vector<1x1x1x8xf32> to vector<1x8xf32>
    %156 = vector.broadcast %155 : vector<1x8xf32> to vector<8x8xf32>
    %157 = arith.addf %153, %156 : vector<8x8xf32>
    %158 = vector.shape_cast %157 : vector<8x8xf32> to vector<1x8x8xf32>
    %c0_120 = arith.constant 0 : index
    %c3_121 = arith.constant 3 : index
    %c0_122 = arith.constant 0 : index
    %c0_123 = arith.constant 0 : index
    %159 = vector.load %arg4[%c0_120, %c3_121, %c0_122, %c0_123] : memref<1x4x32x8xbf16, #tpu.memory_space<vmem>>, vector<1x1x32x8xbf16>
    %160 = vector.shape_cast %159 : vector<1x1x32x8xbf16> to vector<32x8xbf16>
    %cst_124 = arith.constant dense<0.000000e+00> : vector<8x8xf32>
    %161 = tpu.matmul %5, %160, %cst_124 {dimension_numbers = #tpu.dot_dimension_numbers<[1], [0], [0], [1], [0, 0, 1, 1], [], []>} : vector<8x32xbf16>, vector<32x8xbf16>, vector<8x8xf32> -> vector<8x8xf32>
    %c0_125 = arith.constant 0 : index
    %c3_126 = arith.constant 3 : index
    %c0_127 = arith.constant 0 : index
    %c0_128 = arith.constant 0 : index
    %162 = vector.load %arg7[%c0_125, %c3_126, %c0_127, %c0_128] : memref<1x4x1x8xf32, #tpu.memory_space<vmem>>, vector<1x1x1x8xf32>
    %163 = vector.shape_cast %162 : vector<1x1x1x8xf32> to vector<1x8xf32>
    %164 = vector.broadcast %163 : vector<1x8xf32> to vector<8x8xf32>
    %165 = arith.addf %161, %164 : vector<8x8xf32>
    %166 = vector.shape_cast %165 : vector<8x8xf32> to vector<1x8x8xf32>
    %c0_129 = arith.constant 0 : index
    %c3_130 = arith.constant 3 : index
    %c0_131 = arith.constant 0 : index
    %c0_132 = arith.constant 0 : index
    %167 = vector.load %arg5[%c0_129, %c3_130, %c0_131, %c0_132] : memref<1x4x32x8xbf16, #tpu.memory_space<vmem>>, vector<1x1x32x8xbf16>
    %168 = vector.shape_cast %167 : vector<1x1x32x8xbf16> to vector<32x8xbf16>
    %cst_133 = arith.constant dense<0.000000e+00> : vector<8x8xf32>
    %169 = tpu.matmul %5, %168, %cst_133 {dimension_numbers = #tpu.dot_dimension_numbers<[1], [0], [0], [1], [0, 0, 1, 1], [], []>} : vector<8x32xbf16>, vector<32x8xbf16>, vector<8x8xf32> -> vector<8x8xf32>
    %c0_134 = arith.constant 0 : index
    %c3_135 = arith.constant 3 : index
    %c0_136 = arith.constant 0 : index
    %c0_137 = arith.constant 0 : index
    %170 = vector.load %arg8[%c0_134, %c3_135, %c0_136, %c0_137] : memref<1x4x1x8xf32, #tpu.memory_space<vmem>>, vector<1x1x1x8xf32>
    %171 = vector.shape_cast %170 : vector<1x1x1x8xf32> to vector<1x8xf32>
    %172 = vector.broadcast %171 : vector<1x8xf32> to vector<8x8xf32>
    %173 = arith.addf %169, %172 : vector<8x8xf32>
    %174 = vector.shape_cast %173 : vector<8x8xf32> to vector<1x8x8xf32>
    %175 = arith.truncf %158 : vector<1x8x8xf32> to vector<1x8x8xbf16>
    %176 = arith.truncf %166 : vector<1x8x8xf32> to vector<1x8x8xbf16>
    "tpu.trace_start"() <{level = 10 : i32, message = "bqd,bkd->bqk"}> : () -> ()
    %cst_138 = arith.constant dense<0.000000e+00> : vector<1x8x8xf32>
    %177 = tpu.matmul %175, %176, %cst_138 {dimension_numbers = #tpu.dot_dimension_numbers<[2], [2], [1], [1], [0, 0, 0, 1, 1, 1], [0], [0]>} : vector<1x8x8xbf16>, vector<1x8x8xbf16>, vector<1x8x8xf32> -> vector<1x8x8xf32>
    "tpu.trace_stop"() : () -> ()
    %cst_139 = arith.constant 0.353553385 : f32
    %178 = vector.broadcast %cst_139 : f32 to vector<1x8x8xf32>
    %179 = arith.mulf %177, %178 : vector<1x8x8xf32>
    %cst_140 = arith.constant dense<0xFF800000> : vector<1x8xf32>
    %180 = vector.multi_reduction <maximumf>, %179, %cst_140 [2] : vector<1x8x8xf32> to vector<1x8xf32>
    %181 = vector.shape_cast %180 : vector<1x8xf32> to vector<1x8x1xf32>
    %182 = vector.broadcast %181 : vector<1x8x1xf32> to vector<1x8x8xf32>
    %183 = arith.subf %179, %182 : vector<1x8x8xf32>
    %184 = math.exp %183 : vector<1x8x8xf32>
    %cst_141 = arith.constant dense<0.000000e+00> : vector<1x8xf32>
    %185 = vector.multi_reduction <add>, %184, %cst_141 [2] : vector<1x8x8xf32> to vector<1x8xf32>
    %186 = vector.shape_cast %185 : vector<1x8xf32> to vector<1x8x1xf32>
    %187 = tpu.reciprocal %186 {approx = true} : vector<1x8x1xf32> -> vector<1x8x1xf32>
    %188 = vector.broadcast %187 : vector<1x8x1xf32> to vector<1x8x8xf32>
    %189 = arith.mulf %184, %188 : vector<1x8x8xf32>
    %190 = arith.truncf %189 : vector<1x8x8xf32> to vector<1x8x8xbf16>
    %191 = arith.truncf %174 : vector<1x8x8xf32> to vector<1x8x8xbf16>
    "tpu.trace_start"() <{level = 10 : i32, message = "bqk,bkd->bqd"}> : () -> ()
    %cst_142 = arith.constant dense<0.000000e+00> : vector<1x8x8xf32>
    %192 = tpu.matmul %190, %191, %cst_142 {dimension_numbers = #tpu.dot_dimension_numbers<[2], [1], [1], [2], [0, 0, 0, 1, 1, 2], [0], [0]>} : vector<1x8x8xbf16>, vector<1x8x8xbf16>, vector<1x8x8xf32> -> vector<1x8x8xf32>
    "tpu.trace_stop"() : () -> ()
    %193 = vector.shape_cast %192 : vector<1x8x8xf32> to vector<8x8xf32>
    %194 = arith.truncf %193 : vector<8x8xf32> to vector<8x8xbf16>
    %c0_143 = arith.constant 0 : index
    %c3_144 = arith.constant 3 : index
    %c0_145 = arith.constant 0 : index
    %c0_146 = arith.constant 0 : index
    %195 = vector.load %arg9[%c0_143, %c3_144, %c0_145, %c0_146] : memref<1x4x8x32xbf16, #tpu.memory_space<vmem>>, vector<1x1x8x32xbf16>
    %196 = vector.shape_cast %195 : vector<1x1x8x32xbf16> to vector<8x32xbf16>
    %cst_147 = arith.constant dense<0.000000e+00> : vector<8x32xf32>
    %197 = tpu.matmul %194, %196, %cst_147 {dimension_numbers = #tpu.dot_dimension_numbers<[1], [0], [0], [1], [0, 0, 1, 1], [], []>} : vector<8x8xbf16>, vector<8x32xbf16>, vector<8x32xf32> -> vector<8x32xf32>
    %198 = arith.addf %150, %197 : vector<8x32xf32>
    %c0_148 = arith.constant 0 : index
    %c0_149 = arith.constant 0 : index
    %c0_150 = arith.constant 0 : index
    %199 = vector.load %arg10[%c0_148, %c0_149, %c0_150] : memref<1x1x32xf32, #tpu.memory_space<vmem>>, vector<1x1x32xf32>
    %200 = vector.shape_cast %199 : vector<1x1x32xf32> to vector<1x32xf32>
    %201 = vector.broadcast %200 : vector<1x32xf32> to vector<8x32xf32>
    %202 = arith.addf %198, %201 : vector<8x32xf32>
    %203 = arith.truncf %202 : vector<8x32xf32> to vector<8x32xbf16>
    %c0_151 = arith.constant 0 : index
    %c0_152 = arith.constant 0 : index
    %c0_153 = arith.constant 0 : index
    %204 = vector.load %arg11[%c0_151, %c0_152, %c0_153] : memref<1x32x32xbf16, #tpu.memory_space<vmem>>, vector<1x32x32xbf16>
    %205 = vector.shape_cast %204 : vector<1x32x32xbf16> to vector<32x32xbf16>
    %cst_154 = arith.constant dense<0.000000e+00> : vector<8x32xf32>
    %206 = tpu.matmul %203, %205, %cst_154 {dimension_numbers = #tpu.dot_dimension_numbers<[1], [0], [0], [1], [0, 0, 1, 1], [], []>} : vector<8x32xbf16>, vector<32x32xbf16>, vector<8x32xf32> -> vector<8x32xf32>
    %c0_155 = arith.constant 0 : index
    %c0_156 = arith.constant 0 : index
    %c0_157 = arith.constant 0 : index
    %207 = vector.load %arg12[%c0_155, %c0_156, %c0_157] : memref<1x1x32xf32, #tpu.memory_space<vmem>>, vector<1x1x32xf32>
    %208 = vector.shape_cast %207 : vector<1x1x32xf32> to vector<1x32xf32>
    %209 = vector.broadcast %208 : vector<1x32xf32> to vector<8x32xf32>
    %210 = arith.addf %206, %209 : vector<8x32xf32>
    %211 = arith.addf %4, %210 : vector<8x32xf32>
    %cst_158 = arith.constant dense<0.000000e+00> : vector<8xf32>
    %212 = vector.multi_reduction <add>, %211, %cst_158 [1] : vector<8x32xf32> to vector<8xf32>
    %213 = vector.shape_cast %212 : vector<8xf32> to vector<8x1xf32>
    %cst_159 = arith.constant 3.200000e+01 : f32
    %214 = vector.broadcast %cst_159 : f32 to vector<8x1xf32>
    %215 = arith.divf %213, %214 : vector<8x1xf32>
    %216 = vector.broadcast %215 : vector<8x1xf32> to vector<8x32xf32>
    %217 = arith.subf %211, %216 : vector<8x32xf32>
    %218 = arith.mulf %217, %217 : vector<8x32xf32>
    %cst_160 = arith.constant dense<0.000000e+00> : vector<8xf32>
    %219 = vector.multi_reduction <add>, %218, %cst_160 [1] : vector<8x32xf32> to vector<8xf32>
    %220 = vector.shape_cast %219 : vector<8xf32> to vector<8x1xf32>
    %cst_161 = arith.constant 3.200000e+01 : f32
    %221 = vector.broadcast %cst_161 : f32 to vector<8x1xf32>
    %222 = arith.divf %220, %221 : vector<8x1xf32>
    %cst_162 = arith.constant 9.99999974E-6 : f32
    %223 = vector.broadcast %cst_162 : f32 to vector<8x1xf32>
    %224 = arith.addf %222, %223 : vector<8x1xf32>
    %225 = math.rsqrt %224 : vector<8x1xf32>
    %226 = vector.broadcast %225 : vector<8x1xf32> to vector<8x32xf32>
    %227 = arith.mulf %217, %226 : vector<8x32xf32>
    %c0_163 = arith.constant 0 : index
    %c0_164 = arith.constant 0 : index
    %c0_165 = arith.constant 0 : index
    %228 = vector.load %arg13[%c0_163, %c0_164, %c0_165] : memref<1x1x32xf32, #tpu.memory_space<vmem>>, vector<1x1x32xf32>
    %229 = vector.shape_cast %228 : vector<1x1x32xf32> to vector<1x32xf32>
    %230 = vector.broadcast %229 : vector<1x32xf32> to vector<8x32xf32>
    %231 = arith.mulf %227, %230 : vector<8x32xf32>
    %c0_166 = arith.constant 0 : index
    %c0_167 = arith.constant 0 : index
    %c0_168 = arith.constant 0 : index
    %232 = vector.load %arg14[%c0_166, %c0_167, %c0_168] : memref<1x1x32xf32, #tpu.memory_space<vmem>>, vector<1x1x32xf32>
    %233 = vector.shape_cast %232 : vector<1x1x32xf32> to vector<1x32xf32>
    %234 = vector.broadcast %233 : vector<1x32xf32> to vector<8x32xf32>
    %235 = arith.addf %231, %234 : vector<8x32xf32>
    %236 = vector.shape_cast %235 : vector<8x32xf32> to vector<1x8x32xf32>
    %c0_169 = arith.constant 0 : index
    %c0_170 = arith.constant 0 : index
    %c0_171 = arith.constant 0 : index
    %237 = vector.load %arg18[%c0_169, %c0_170, %c0_171] : memref<1x8x32xf32, #tpu.memory_space<vmem>>, vector<1x8x32xf32>
    tpu.vector_store %arg18[%c0_169, %c0_170, %c0_171], %236 {strides = array<i32>} : memref<1x8x32xf32, #tpu.memory_space<vmem>>, vector<1x8x32xf32>,
    %c2_i32 = arith.constant 2 : i32
    %238 = arith.cmpi eq, %arg1, %c2_i32 : i32
    %239 = arith.extui %238 : i1 to i32
    %c0_i32_172 = arith.constant 0 : i32
    %240 = arith.cmpi ne, %239, %c0_i32_172 : i32
    scf.if %240 {
      %241 = vector.shape_cast %235 : vector<8x32xf32> to vector<1x8x32xf32>
      %242 = vector.extract_strided_slice %241 {offsets = [0, 0, 0], sizes = [1, 1, 32], strides = [1, 1, 1]} : vector<1x8x32xf32> to vector<1x1x32xf32>
      %243 = vector.shape_cast %242 : vector<1x1x32xf32> to vector<1x32xf32>
      %c0_173 = arith.constant 0 : index
      %c0_174 = arith.constant 0 : index
      %244 = vector.load %arg15[%c0_173, %c0_174] : memref<1x32xf32, #tpu.memory_space<vmem>>, vector<1x32xf32>
      %245 = arith.mulf %243, %244 : vector<1x32xf32>
      %cst_175 = arith.constant dense<0.000000e+00> : vector<1xf32>
      %246 = vector.multi_reduction <add>, %245, %cst_175 [1] : vector<1x32xf32> to vector<1xf32>
      %247 = vector.shape_cast %246 : vector<1xf32> to vector<1x1xf32>
      %c0_176 = arith.constant 0 : index
      %c0_177 = arith.constant 0 : index
      %248 = vector.load %arg16[%c0_176, %c0_177] : memref<1x1xf32, #tpu.memory_space<vmem>>, vector<1x1xf32>
      %249 = arith.addf %247, %248 : vector<1x1xf32>
      %250 = vector.shape_cast %249 : vector<1x1xf32> to vector<1x1x1xf32>
      %c0_178 = arith.constant 0 : index
      %c0_179 = arith.constant 0 : index
      %c0_180 = arith.constant 0 : index
      %251 = vector.load %arg17[%c0_178, %c0_179, %c0_180] : memref<1x1x1xf32, #tpu.memory_space<vmem>>, vector<1x1x1xf32>
      tpu.vector_store %arg17[%c0_178, %c0_179, %c0_180], %250 {strides = array<i32>} : memref<1x1x1xf32, #tpu.memory_space<vmem>>, vector<1x1x1xf32>,
    } else {
    }
    return
  }
  func.func @transform_0(%arg0: i32, %arg1: i32) -> (i32, i32, i32) {
    %c0_i32 = arith.constant 0 : i32
    %c0_i32_0 = arith.constant 0 : i32
    %c0_i32_1 = arith.constant 0 : i32
    return %arg0, %c0_i32, %c0_i32_0 : i32, i32, i32
  }
  func.func @transform_1(%arg0: i32, %arg1: i32) -> (i32, i32, i32, i32) {
    %c0_i32 = arith.constant 0 : i32
    %c0_i32_0 = arith.constant 0 : i32
    %c0_i32_1 = arith.constant 0 : i32
    %c0_i32_2 = arith.constant 0 : i32
    return %arg1, %c0_i32, %c0_i32_0, %c0_i32_1 : i32, i32, i32, i32
  }
  func.func @transform_2(%arg0: i32, %arg1: i32) -> (i32, i32, i32, i32) {
    %c0_i32 = arith.constant 0 : i32
    %c0_i32_0 = arith.constant 0 : i32
    %c0_i32_1 = arith.constant 0 : i32
    %c0_i32_2 = arith.constant 0 : i32
    return %arg1, %c0_i32, %c0_i32_0, %c0_i32_1 : i32, i32, i32, i32
  }
  func.func @transform_3(%arg0: i32, %arg1: i32) -> (i32, i32, i32, i32) {
    %c0_i32 = arith.constant 0 : i32
    %c0_i32_0 = arith.constant 0 : i32
    %c0_i32_1 = arith.constant 0 : i32
    %c0_i32_2 = arith.constant 0 : i32
    return %arg1, %c0_i32, %c0_i32_0, %c0_i32_1 : i32, i32, i32, i32
  }
  func.func @transform_4(%arg0: i32, %arg1: i32) -> (i32, i32, i32, i32) {
    %c0_i32 = arith.constant 0 : i32
    %c0_i32_0 = arith.constant 0 : i32
    %c0_i32_1 = arith.constant 0 : i32
    %c0_i32_2 = arith.constant 0 : i32
    return %arg1, %c0_i32, %c0_i32_0, %c0_i32_1 : i32, i32, i32, i32
  }
  func.func @transform_5(%arg0: i32, %arg1: i32) -> (i32, i32, i32, i32) {
    %c0_i32 = arith.constant 0 : i32
    %c0_i32_0 = arith.constant 0 : i32
    %c0_i32_1 = arith.constant 0 : i32
    %c0_i32_2 = arith.constant 0 : i32
    return %arg1, %c0_i32, %c0_i32_0, %c0_i32_1 : i32, i32, i32, i32
  }
  func.func @transform_6(%arg0: i32, %arg1: i32) -> (i32, i32, i32, i32) {
    %c0_i32 = arith.constant 0 : i32
    %c0_i32_0 = arith.constant 0 : i32
    %c0_i32_1 = arith.constant 0 : i32
    %c0_i32_2 = arith.constant 0 : i32
    return %arg1, %c0_i32, %c0_i32_0, %c0_i32_1 : i32, i32, i32, i32
  }
  func.func @transform_7(%arg0: i32, %arg1: i32) -> (i32, i32, i32, i32) {
    %c0_i32 = arith.constant 0 : i32
    %c0_i32_0 = arith.constant 0 : i32
    %c0_i32_1 = arith.constant 0 : i32
    %c0_i32_2 = arith.constant 0 : i32
    return %arg1, %c0_i32, %c0_i32_0, %c0_i32_1 : i32, i32, i32, i32
  }
  func.func @transform_8(%arg0: i32, %arg1: i32) -> (i32, i32, i32) {
    %c0_i32 = arith.constant 0 : i32
    %c0_i32_0 = arith.constant 0 : i32
    %c0_i32_1 = arith.constant 0 : i32
    return %arg1, %c0_i32, %c0_i32_0 : i32, i32, i32
  }
  func.func @transform_9(%arg0: i32, %arg1: i32) -> (i32, i32, i32) {
    %c0_i32 = arith.constant 0 : i32
    %c0_i32_0 = arith.constant 0 : i32
    %c0_i32_1 = arith.constant 0 : i32
    return %arg1, %c0_i32, %c0_i32_0 : i32, i32, i32
  }
  func.func @transform_10(%arg0: i32, %arg1: i32) -> (i32, i32, i32) {
    %c0_i32 = arith.constant 0 : i32
    %c0_i32_0 = arith.constant 0 : i32
    %c0_i32_1 = arith.constant 0 : i32
    return %arg1, %c0_i32, %c0_i32_0 : i32, i32, i32
  }
  func.func @transform_11(%arg0: i32, %arg1: i32) -> (i32, i32, i32) {
    %c0_i32 = arith.constant 0 : i32
    %c0_i32_0 = arith.constant 0 : i32
    %c0_i32_1 = arith.constant 0 : i32
    return %arg1, %c0_i32, %c0_i32_0 : i32, i32, i32
  }
  func.func @transform_12(%arg0: i32, %arg1: i32) -> (i32, i32, i32) {
    %c0_i32 = arith.constant 0 : i32
    %c0_i32_0 = arith.constant 0 : i32
    %c0_i32_1 = arith.constant 0 : i32
    return %arg1, %c0_i32, %c0_i32_0 : i32, i32, i32
  }
  func.func @transform_13(%arg0: i32, %arg1: i32) -> (i32, i32) {
    %c0_i32 = arith.constant 0 : i32
    %c0_i32_0 = arith.constant 0 : i32
    %c0_i32_1 = arith.constant 0 : i32
    return %c0_i32, %c0_i32_0 : i32, i32
  }
  func.func @transform_14(%arg0: i32, %arg1: i32) -> (i32, i32) {
    %c0_i32 = arith.constant 0 : i32
    %c0_i32_0 = arith.constant 0 : i32
    %c0_i32_1 = arith.constant 0 : i32
    return %c0_i32, %c0_i32_0 : i32, i32
  }
  func.func @transform_15(%arg0: i32, %arg1: i32) -> (i32, i32, i32) {
    %c0_i32 = arith.constant 0 : i32
    %c0_i32_0 = arith.constant 0 : i32
    %c0_i32_1 = arith.constant 0 : i32
    return %arg0, %c0_i32, %c0_i32_0 : i32, i32, i32
  }
}

</mosaic_0001>

<bundles_post_ra>
// kernel: tpu_custom_call.1
= control target key start
LH: loop header
LB: loop body
LE: loop exit
PB: predicated region body
PF: predicated region fallthrough
CT: control target
= control target key end

     0   :  { %s3032_s20 = smov 0   ;;  %s3034_s21 = smov 0   ;;  %s3389_s0 = inlined_call_operand.vmem [shape: f32[2,8,32], index: 0, kind: input, shape index: {}]   ;;  %s3390_s1 = inlined_call_operand.vmem [shape: bf16[3,4,32,8], index: 1, kind: input, shape index: {}]   ;;  %s3391_s2 = inlined_call_operand.vmem [shape: bf16[3,4,32,8], index: 2, kind: input, shape index: {}]   ;;  %s3392_s3 = inlined_call_operand.vmem [shape: bf16[3,4,32,8], index: 3, kind: input, shape index: {}]   ;;  %s3393_s4 = inlined_call_operand.vmem [shape: f32[3,4,1,8], index: 4, kind: input, shape index: {}]   ;;  %s3394_s5 = inlined_call_operand.vmem [shape: f32[3,4,1,8], index: 5, kind: input, shape index: {}]   ;;  %s3395_s6 = inlined_call_operand.vmem [shape: f32[3,4,1,8], index: 6, kind: input, shape index: {}]   ;;  %s3396_s7 = inlined_call_operand.vmem [shape: bf16[3,4,8,32], index: 7, kind: input, shape index: {}]   ;;  %s3397_s8 = inlined_call_operand.vmem [shape: f32[3,1,32], index: 8, kind: input, shape index: {}]   ;;  %s3398_s9 = inlined_call_operand.vmem [shape: bf16[3,32,32], index: 9, kind: input, shape index: {}]   ;;  %s3399_s10 = inlined_call_operand.vmem [shape: f32[3,1,32], index: 10, kind: input, shape index: {}]   ;;  %s3400_s11 = inlined_call_operand.vmem [shape: f32[3,1,32], index: 11, kind: input, shape index: {}]   ;;  %s3401_s12 = inlined_call_operand.vmem [shape: f32[3,1,32], index: 12, kind: input, shape index: {}]   ;;  %s3402_s13 = inlined_call_operand.vmem [shape: f32[1,32], index: 13, kind: input, shape index: {}]   ;;  %s3403_s14 = inlined_call_operand.<no memory space> [shape: f32[1,1], index: 14, kind: input, shape index: {}]   ;;  %s3404_s15 = inlined_call_operand.vmem [shape: f32[2,1,1], index: 15, kind: output, shape index: {}]  }
   0x1   :  { %3410 = sst [smem:[#allocation11_spill]] %s3389_s0  ;;  %v20_v0 = vstv %s3403_s14  ;;  %s3036_s22 = smov 0  }
   0x2   :  { %3411 = sst [smem:[#allocation12_spill]] %s3390_s1  ;;  %21 = vst [vmem:[#allocation3] sm:$0x1] %v20_v0  ;;  %s3038_s23 = smov 0  }
   0x3   :  { %3412 = sst [smem:[#allocation13_spill]] %s3391_s2  ;;  %s3040_s24 = smov 0  }
   0x4   :  { %3413 = sst [smem:[#allocation14_spill]] %s3392_s3 }
   0x5   :  { %3414 = sst [smem:[#allocation15_spill]] %s3393_s4 }
   0x6   :  { %3415 = sst [smem:[#allocation16_spill]] %s3394_s5 }
   0x7   :  { %3416 = sst [smem:[#allocation17_spill]] %s3395_s6 }
   0x8   :  { %3417 = sst [smem:[#allocation18_spill]] %s3396_s7 }
   0x9   :  { %3418 = sst [smem:[#allocation19_spill]] %s3402_s13 }
   0xa   :  { %3419 = sst [smem:[#allocation20_spill]] %s3404_s15 }
   0xb LB: > { %3420 = sst [smem:[#allocation4_spill]] %s2929_s20  ;;  %s36_s14 = sadd.s32 1, %s2937_s22  ;;  %s2945_s24 = sphi %s3040_s24, %s27_s24   ;;  %s2941_s23 = sphi %s3038_s23, %s3446_s23   ;;  %s2937_s22 = sphi %s3036_s22, %s3445_s22   ;;  %s2933_s21 = sphi %s3034_s21, %s3444_s21   ;;  %s2929_s20 = sphi %s3032_s20, %s3443_s20  }
   0xc   : > { %3421 = sst [smem:[#allocation5_spill]] %s2937_s22  ;;  %s39_s25 = sadd.s32 1, %s2941_s23 }
   0xd   : > { %3422 = sst [smem:[#allocation6_spill]] %s2941_s23  ;;  %p37_p0 = scmp.ge.s32.totalorder %s36_s14, 3 }
   0xe   : > { %3423 = sst [smem:[#allocation7_spill]] %s2945_s24  ;;  %p2443_p1 = scmp.ge.s32.totalorder %s2945_s24, 1 }
   0xf   : > { %p559_p2 = scmp.lt.s32.totalorder %s2945_s24, 7  ;;  %s3448_s14 = smov (%p37_p0, %s36_s14), 0 }
  0x10   : > { %3424 = sst [smem:[#allocation8_spill]] %s3448_s14  ;;  %s3450_s25 = smov (!%p37_p0, %s39_s25), %s2941_s23 }
  0x11   : > { %p560_p3 = pnand %p2443_p1, %p559_p2  ;;  %p41_p4 = scmp.ge.s32.totalorder %s3450_s25, 2 }
  0x13   : > { %s3452_s25 = smov (%p41_p4, %s3450_s25), 0  ;;  %563 = sbr.rel (%p560_p3) target bundleno = 4632 (0x1218), region = 80 }
  0x14   : > { %3425 = sst [smem:[#allocation9_spill]] %s3452_s25 }
  0x1a   : > { %p653_p5 = scmp.lt.s32.totalorder %s2933_s21, 1  ;;  %p657_p6 = scmp.lt.s32.totalorder %s2929_s20, 2 }
  0x1b   : > { %s3428_s0 = sld [smem:[#allocation11_spill]]  ;;  %s3429_s1 = sld [smem:[#allocation12_spill]] }
  0x1c   : > { %s3454_s21 = smov (!%p653_p5, %s2933_s21), 1  ;;  %s3430_s2 = sld [smem:[#allocation13_spill]] }
  0x1d   : > { %3426 = sst [smem:[#allocation10_spill]] %s3454_s21  ;;  %s2444_s27 = sshll.u32 %s3454_s21, 3 }
  0x1e   : > { %s3068_s26 = scalar_select %p657_p6, %s2929_s20, 2 }
  0x1f   : > { %s3431_s3 = sld [smem:[#allocation14_spill]]  ;;  %s3432_s4 = sld [smem:[#allocation15_spill]] }
  0x20   : > { %s2577_s19 = sshll.u32 %s3068_s26, 6  ;;  %s2451_s30 = sshll.u32 %s3068_s26, 2 }
  0x21   : > { %s656_s18 = scalar_lea.vmem %s3428_s0, %s2444_s27  ;;  %s3082_s23 = scalar_lea.vmem %s3429_s1, %s2577_s19 }
  0x22   : > { %s3087_s13 = scalar_lea.vmem %s3430_s2, %s2577_s19  ;;  %s3433_s5 = sld [smem:[#allocation16_spill]] }
  0x23   : > { %s3434_s6 = sld [smem:[#allocation17_spill]]  ;;  %s2580_s2 = sshll.u32 %s3068_s26, 4 }
  0x24   : > { %s3435_s7 = sld [smem:[#allocation18_spill]]  ;;  %s691_s17 = scalar_lea.vmem %s3397_s8, %s3068_s26 }
  0x25   : > { %s3092_s29 = scalar_lea.vmem %s3431_s3, %s2577_s19  ;;  %s3098_s27 = scalar_lea.vmem %s3432_s4, %s2451_s30 }
  0x26   : > { %s3123_s0 = scalar_lea.vmem %s3398_s9, %s2580_s2  ;;  %s699_s1 = scalar_lea.vmem %s3399_s10, %s3068_s26 }
  0x27   : > { %s3436_s21 = sld [smem:[#allocation4_spill]] }
  0x28   : > { %s3103_s25 = scalar_lea.vmem %s3433_s5, %s2451_s30 }
  0x29   : > { %s3108_s24 = scalar_lea.vmem %s3434_s6, %s2451_s30  ;;  %s702_s6 = scalar_lea.vmem %s3400_s11, %s3068_s26 }
  0x2a   : > { %s3114_s28 = scalar_lea.vmem %s3435_s7, %s2580_s2  ;;  %s705_s7 = scalar_lea.vmem %s3401_s12, %s3068_s26 }
  0x2d   : > { %p2458_p7 = scmp.ne.s32.totalorder %s3436_s21, 0 }
  0x2e   : > { %v714_v1 = vld [vmem:[%s656_s18] sm:$0xff] (!%p2458_p7)  ;;  %vm715_vm0 = vcmask (!%p2458_p7), 261120  }
  0x2f   : > { %713 = sbr.rel (%p2458_p7) target bundleno = 54 (0x36), region = 84  ;;  %716 = vst.msk [vmem:[#allocation2] sm:$0xff] (!%p2458_p7), %vm715_vm0, %v714_v1 }
  0x36 PF: > { %v2863_v2 = vld [vmem:[%s3087_s13] sm:$0xff]   ;;  %v2947_v3 = vmov 0.0   ;;  %v2864_v4 = vld [vmem:[%s3087_s13 + $0x8] sm:$0xff]   ;;  %vm2948_vm1 = vmmov 0   ;;  %vm742_vm2 = vcmask 261120   ;;  %vm914_vm3 = vcmask 64512  }
  0x37   : > { %2653 = vmatprep.subr.bf16.mxu1 %v2947_v3  ;;  %2645 = vmatprep.subr.bf16.mxu0 %v2947_v3  ;;  %v2865_v5 = vld [vmem:[%s3082_s23] sm:$0xff]   ;;  %v2866_v7 = vld [vmem:[%s3082_s23 + $0x8] sm:$0xff]   ;;  %vm978_vm4 = vcmask 1043456   ;;  %v2871_v45 = vld [vmem:[%s3082_s23 + $0x10] sm:$0xff]   ;;  %s3437_s18 = sld [smem:[#allocation4_spill]] }
  0x38   : > { %2654 = vmatpush3.bf16.msra.mxu1 %v2863_v2  ;;  %2657 = vmatprep.mubr.msk.bf16.mxu1 %vm2948_vm1, %v2947_v3  ;;  %v3146_v6 = vld [vmem:[#allocation2] sm:$0xff]  ;;  %v2868_v25 = vld [vmem:[%s3092_s29 + $0x8] sm:$0xff]   ;;  %v2872_v46 = vld [vmem:[%s3082_s23 + $0x18] sm:$0xff]  }
  0x39   : > { %2655 = vmatprep.subr.bf16.mxu1 %v2947_v3  ;;  %2649 = vmatprep.mubr.msk.bf16.mxu0 %vm2948_vm1, %v2947_v3  ;;  %v3153_v8 = vpack.c.bf16 %v3146_v6, %v3146_v6  ;;  %v2463_v9 = vld [vmem:[%s3103_s25] ss:$0 sm:$0xff]  ;;  %v2869_v50 = vld [vmem:[%s3087_s13 + $0x10] sm:$0xff]   ;;  %v2870_v52 = vld [vmem:[%s3087_s13 + $0x18] sm:$0xff]  }
  0x3a   : > { %2646 = vmatpush3.bf16.msra.mxu0 %v2865_v5  ;;  %v2459_v14 = vld [vmem:[%s3098_s27] ss:$0 sm:$0xff]  ;;  %v2487_v61 = vld [vmem:[%s3103_s25 + $0x1] ss:$0 sm:$0xff] }
  0x3b   : > { %2647 = vmatprep.subr.bf16.mxu0 %v2947_v3  ;;  %v2867_v24 = vld [vmem:[%s3092_s29] sm:$0xff]  }
  0x3c   : > { %2656 = vmatpush3.bf16.msra.mxu1 %v2864_v4  ;;  %v2467_v40 = vld [vmem:[%s3108_s24] ss:$0 sm:$0xff]  ;;  %v2478_v2 = vld [vmem:[%s3098_s27 + $0x1] ss:$0 sm:$0xff] }
  0x3d   : > { %2669 = vmatprep.subr.bf16.mxu1 %v2947_v3  ;;  %p2574_p8 = scmp.ne.s32.totalorder %s3437_s18, 2 }
  0x3e   : > { %2648 = vmatpush3.bf16.msra.mxu0 %v2866_v7  ;;  %vm2241_vm5 = vcmask (!%p2574_p8), 253952   ;;  %vm2247_vm6 = vcmask (!%p2574_p8), 0   ;;  %s3440_s26 = sld [smem:[#allocation20_spill]] (!%p2574_p8) }
  0x3f   : > { %2658 = vmatmul.mubr.msk.bf16.vlgmr.msra.gmra.mrb[0].mxu1 %vm742_vm2, %v3153_v8  ;;  %2661 = vmatprep.subr.bf16.mxu0 %v2947_v3 }
  0x40   : > { %2671 = vmatprep.mubr.msk.bf16.mxu1 %vm2948_vm1, %v2947_v3 }
  0x41   : > { %2650 = vmatmul.mubr.msk.bf16.vlgmr.msra.gmra.mrb[0].mxu0 %vm742_vm2, %v3153_v8 }
  0x42   : > { %2665 = vmatprep.mubr.msk.bf16.mxu0 %vm2948_vm1, %v2947_v3  ;;  %2662 = vmatpush3.bf16.msra.mxu0 %v2867_v24 }
  0x43   : > { %2663 = vmatprep.subr.bf16.mxu0 %v2947_v3 }
  0x46   : > { %2664 = vmatpush3.bf16.msra.mxu0 %v2868_v25 }
  0x47   : > { %2675 = vmatprep.subr.bf16.mxu0 %v2947_v3 }
  0x49   : > { %2666 = vmatmul.mubr.msk.bf16.vlgmr.msra.gmra.mrb[4].mxu0 %vm742_vm2, %v3153_v8 }
  0x4a   : > { %2677 = vmatprep.mubr.msk.bf16.mxu0 %vm2948_vm1, %v2947_v3 }
 0x112   : > { %v843_v10 = vpop.f32.mrb[0].mxu1 }
 0x113   : > { %v844_v11 = vadd.f32 %v2463_v9, %v843_v10  ;;  %v2659_v12 = vpop.f32.mrb[1].mxu1 }
 0x114   : > { %v846_v13 = vpop.f32.mrb[2].mxu1  ;;  %v780_v15 = vpop.f32.mrb[0].mxu0  ;;  %v2874_v12 = vld [vmem:[%s3092_s29 + $0x18] sm:$0xff]  }
 0x115   : > { %v913_v16 = vpack.c.bf16 %v844_v11, %v844_v11  ;;  %v2660_v17 = vpop.f32.mrb[3].mxu1  ;;  %v2651_v18 = vpop.f32.mrb[1].mxu0  ;;  %v781_v21 = vadd.f32 %v2459_v14, %v780_v15  ;;  %v2873_v11 = vld [vmem:[%s3092_s29 + $0x10] sm:$0xff]  }
 0x116   : > { %v783_v19 = vpop.f32.mrb[2].mxu0 }
 0x117   : > { %v919_v20 = vsel %vm914_vm3, %v913_v16, 0  ;;  %v2652_v22 = vpop.f32.mrb[3].mxu0  ;;  %v912_v23 = vpack.c.bf16 %v781_v21, %v781_v21  ;;  %v2496_v19 = vld [vmem:[%s3108_s24 + $0x1] ss:$0 sm:$0xff] }
 0x118   : > { %2670 = vmatpush3.bf16.xpose.msra.mxu1 %v919_v20 }
 0x119   : > { %2681 = vmatprep.subr.bf16.mxu1 %v2947_v3 }
 0x11c   : > { %v906_v37 = vpop.f32.mrb[4].mxu0 }
 0x11d   : > { %v2667_v38 = vpop.f32.mrb[5].mxu0  ;;  %v907_v42 = vadd.f32 %v2467_v40, %v906_v37  ;;  %v2875_v40 = vld [vmem:[%s3087_s13 + $0x20] sm:$0xff]  }
 0x11e   : > { %v909_v39 = vpop.f32.mrb[6].mxu0 }
 0x11f   : > { %2672 = vmatmul.mubr.msk.bf16.vlgmr.msra.gmra.mrb[4].mxu1 %vm914_vm3, %v912_v23  ;;  %v2668_v41 = vpop.f32.mrb[7].mxu0  ;;  %v974_v43 = vpack.c.bf16 %v907_v42, %v907_v42  ;;  %v2876_v42 = vld [vmem:[%s3087_s13 + $0x28] sm:$0xff]  }
 0x120   : > { %2685 = vmatprep.mubr.msk.bf16.mxu1 %vm2948_vm1, %v2947_v3  ;;  %2682 = vmatpush3.bf16.msra.mxu1 %v2871_v45 }
 0x121   : > { %v980_v44 = vsel %vm978_vm4, %v974_v43, 0  ;;  %2683 = vmatprep.subr.bf16.mxu1 %v2947_v3 }
 0x122   : > { %2676 = vmatpush3.bf16.msra.mxu0 %v980_v44  ;;  %v2877_v44 = vld [vmem:[%s3082_s23 + $0x20] sm:$0xff]  }
 0x123   : > { %2689 = vmatprep.subr.bf16.mxu0 %v2947_v3 }
 0x124   : > { %2684 = vmatpush3.bf16.msra.mxu1 %v2872_v46 }
 0x125   : > { %2697 = vmatprep.subr.bf16.mxu1 %v2947_v3 }
 0x127   : > { %2686 = vmatmul.mubr.msk.bf16.vlgmr.msra.gmra.mrb[8].mxu1 %vm742_vm2, %v3153_v8 }
 0x128   : > { %2701 = vmatprep.mubr.msk.bf16.mxu1 %vm2948_vm1, %v2947_v3  ;;  %2698 = vmatpush3.bf16.msra.mxu1 %v2873_v11 }
 0x129   : > { %2699 = vmatprep.subr.bf16.mxu1 %v2947_v3 }
 0x12c   : > { %2700 = vmatpush3.bf16.msra.mxu1 %v2874_v12 }
 0x12d   : > { %2711 = vmatprep.subr.bf16.mxu1 %v2947_v3 }
 0x12f   : > { %2702 = vmatmul.mubr.msk.bf16.vlgmr.msra.gmra.mrb[12].mxu1 %vm742_vm2, %v3153_v8 }
 0x130   : > { %2713 = vmatprep.mubr.msk.bf16.mxu1 %vm2948_vm1, %v2947_v3 }
 0x1f2   : > { %v955_v26 = vpop.f32.mrb[4].mxu1 }
 0x1f3   : > { %v961_v27 = vmul.f32 0.35355338, %v955_v26  ;;  %v2673_v28 = vpop.f32.mrb[5].mxu1 }
 0x1f4   : > { %v958_v29 = vpop.f32.mrb[6].mxu1 }
 0x1f5   : > { %v2674_v30 = vpop.f32.mrb[7].mxu1  ;;  %v962_v31 = vsel %vm914_vm3, %v961_v27, -inf }
 0x1f6   : > { %963 = vmax.xlane.f32.xlu0 %v962_v31 }
 0x1fa   : > { %v1083_v53 = vpop.f32.mrb[8].mxu1 }
 0x1fb   : > { %v2687_v54 = vpop.f32.mrb[9].mxu1  ;;  %v1084_v9 = vadd.f32 %v2478_v2, %v1083_v53 }
 0x1fc   : > { %v1086_v55 = vpop.f32.mrb[10].mxu1  ;;  %v2519_v54 = vld [vmem:[%s3103_s25 + $0x2] ss:$0 sm:$0xff] }
 0x1fd   : > { %v2688_v56 = vpop.f32.mrb[11].mxu1  ;;  %v1219_v10 = vpack.c.bf16 %v1084_v9, %v1084_v9 }
 0x202   : > { %v1213_v20 = vpop.f32.mrb[12].mxu1 }
 0x203   : > { %v1214_v21 = vadd.f32 %v2496_v19, %v1213_v20  ;;  %v2703_v22 = vpop.f32.mrb[13].mxu1 }
 0x204   : > { %v1216_v23 = vpop.f32.mrb[14].mxu1 }
 0x205   : > { %v1280_v24 = vpack.c.bf16 %v1214_v21, %v1214_v21  ;;  %v2704_v25 = vpop.f32.mrb[15].mxu1 }
 0x207   : > { %v1285_v26 = vsel %vm978_vm4, %v1280_v24, 0 }
 0x208   : > { %2712 = vmatpush3.bf16.msra.mxu1 %v1285_v26 }
 0x209   : > { %2723 = vmatprep.subr.bf16.mxu1 %v2947_v3 }
 0x283   : > { %v964_v32 = vpop.xlane.xlu0 %963 }
 0x284   : > { %v965_v33 = vsub.f32 %v961_v27, %v964_v32  ;;  %v2502_v32 = vld [vmem:[%s3114_s28 + $0x4] sm:$0xf] }
 0x286   : > { %v966_v34 = vmul.f32 1.442695, %v965_v33  ;;  %v1334_v33 = vsel %vm978_vm4, %v2502_v32, 0 }
 0x288   : > { %2889 = vpow2.f32 %v966_v34 }
 0x292   : > { %v2890_v35 = vpop.eup %2889 }
 0x293   : > { %v968_v36 = vsel %vm914_vm3, %v2890_v35, 0.0 }
 0x294   : > { %969 = vadd.xlane.f32.xlu0 %v968_v36  ;;  %v1023_v36 = vld [vmem:[%s3114_s28] sm:$0xf] }
 0x295   : > { %v1380_v39 = vsel %vm978_vm4, %v1023_v36, 0 }
 0x321   : > { %v970_v47 = vpop.xlane.xlu0 %969 }
 0x322   : > { %2891 = vrcp.f32 %v970_v47 }
 0x32c   : > { %v2892_v48 = vpop.eup %2891 }
 0x32d   : > { %v972_v49 = vmul.f32 %v2892_v48, %v2890_v35 }
 0x32f   : > { %v973_v51 = vpack.c.bf16 %v972_v49, %v972_v49  ;;  %v2878_v49 = vld [vmem:[%s3082_s23 + $0x28] sm:$0xff]  }
 0x331   : > { %2678 = vmatmul.mubr.msk.bf16.vlgmr.msra.gmra.mrb[8].mxu0 %vm914_vm3, %v973_v51 }
 0x332   : > { %2690 = vmatpush3.bf16.msra.mxu0 %v2869_v50  ;;  %2693 = vmatprep.mubr.msk.bf16.mxu0 %vm2948_vm1, %v2947_v3 }
 0x333   : > { %2691 = vmatprep.subr.bf16.mxu0 %v2947_v3 }
 0x336   : > { %2692 = vmatpush3.bf16.msra.mxu0 %v2870_v52 }
 0x337   : > { %2705 = vmatprep.subr.bf16.mxu0 %v2947_v3 }
 0x339   : > { %2694 = vmatmul.mubr.msk.bf16.vlgmr.msra.gmra.mrb[12].mxu0 %vm742_vm2, %v3153_v8 }
 0x33a   : > { %2707 = vmatprep.mubr.msk.bf16.mxu0 %vm2948_vm1, %v2947_v3 }
 0x404   : > { %v3205_v57 = vpop.f32.mrb[8].mxu0 }
 0x405   : > { %v2679_v58 = vpop.f32.mrb[9].mxu0  ;;  %v1022_v41 = vpack.c.bf16 %v3205_v57, %v3205_v57 }
 0x406   : > { %v1019_v59 = vpop.f32.mrb[10].mxu0 }
 0x407   : > { %v2680_v60 = vpop.f32.mrb[11].mxu0 }
 0x40c   : > { %v1148_v62 = vpop.f32.mrb[12].mxu0 }
 0x40d   : > { %v1149_v63 = vadd.f32 %v2487_v61, %v1148_v62  ;;  %v2695_v0 = vpop.f32.mrb[13].mxu0 }
 0x40e   : > { %v1151_v1 = vpop.f32.mrb[14].mxu0 }
 0x40f   : > { %v1220_v4 = vpack.c.bf16 %v1149_v63, %v1149_v63  ;;  %v2696_v5 = vpop.f32.mrb[15].mxu0 }
 0x411   : > { %v1225_v7 = vsel %vm914_vm3, %v1220_v4, 0  ;;  %v2510_v4 = vld [vmem:[%s3098_s27 + $0x2] ss:$0 sm:$0xff] }
 0x412   : > { %2706 = vmatpush3.bf16.xpose.msra.mxu0 %v1225_v7 }
 0x413   : > { %2717 = vmatprep.subr.bf16.mxu0 %v2947_v3 }
 0x419   : > { %2708 = vmatmul.mubr.msk.bf16.vlgmr.msra.gmra.mrb[16].mxu0 %vm914_vm3, %v1219_v10 }
 0x41a   : > { %2719 = vmatprep.mubr.msk.bf16.mxu0 %vm2948_vm1, %v2947_v3  ;;  %2718 = vmatpush3.bf16.msra.mxu0 %v1334_v33 }
 0x41b   : > { %2729 = vmatprep.subr.bf16.mxu0 %v2947_v3 }
 0x4ec   : > { %v1261_v13 = vpop.f32.mrb[16].mxu0 }
 0x4ed   : > { %v1267_v14 = vmul.f32 0.35355338, %v1261_v13  ;;  %v2709_v15 = vpop.f32.mrb[17].mxu0  ;;  %v2879_v13 = vld [vmem:[%s3092_s29 + $0x20] sm:$0xff]  }
 0x4ee   : > { %v1264_v16 = vpop.f32.mrb[18].mxu0 }
 0x4ef   : > { %v2710_v17 = vpop.f32.mrb[19].mxu0  ;;  %v1268_v18 = vsel %vm914_vm3, %v1267_v14, -inf }
 0x4f0   : > { %1269 = vmax.xlane.f32.xlu1 %v1268_v18 }
 0x57d   : > { %v1270_v27 = vpop.xlane.xlu1 %1269 }
 0x57e   : > { %v1271_v28 = vsub.f32 %v1267_v14, %v1270_v27  ;;  %v2880_v14 = vld [vmem:[%s3092_s29 + $0x28] sm:$0xff]  }
 0x580   : > { %v1272_v29 = vmul.f32 1.442695, %v1271_v28 }
 0x582   : > { %2893 = vpow2.f32 %v1272_v29  ;;  %v2528_v29 = vld [vmem:[%s3108_s24 + $0x2] ss:$0 sm:$0xff] }
 0x58c   : > { %v2894_v30 = vpop.eup %2893 }
 0x58d   : > { %v1274_v31 = vsel %vm914_vm3, %v2894_v30, 0.0 }
 0x58e   : > { %1275 = vadd.xlane.f32.xlu1 %v1274_v31 }
 0x61b   : > { %v1276_v34 = vpop.xlane.xlu1 %1275 }
 0x61c   : > { %2895 = vrcp.f32 %v1276_v34  ;;  %v2534_v34 = vld [vmem:[%s3114_s28 + $0x8] sm:$0xf] }
 0x626   : > { %v2896_v35 = vpop.eup %2895 }
 0x627   : > { %v1278_v37 = vmul.f32 %v2896_v35, %v2894_v30  ;;  %v1732_v35 = vsel %vm978_vm4, %v2534_v34, 0 }
 0x629   : > { %v1279_v38 = vpack.c.bf16 %v1278_v37, %v1278_v37 }
 0x62b   : > { %2714 = vmatmul.mubr.msk.bf16.vlgmr.msra.gmra.mrb[16].mxu1 %vm914_vm3, %v1279_v38 }
 0x62c   : > { %2724 = vmatpush3.bf16.msra.mxu1 %v1380_v39  ;;  %2725 = vmatprep.mubr.msk.bf16.mxu1 %vm2948_vm1, %v2947_v3 }
 0x62d   : > { %2737 = vmatprep.subr.bf16.mxu1 %v2947_v3 }
 0x633   : > { %2726 = vmatmul.mubr.msk.bf16.vlgmr.msra.gmra.mrb[20].mxu1 %vm914_vm3, %v1022_v41  ;;  %v2884_v41 = vld [vmem:[%s3082_s23 + $0x38] sm:$0xff]  }
 0x634   : > { %2738 = vmatpush3.bf16.msra.mxu1 %v2875_v40  ;;  %2741 = vmatprep.mubr.msk.bf16.mxu1 %vm2948_vm1, %v2947_v3  ;;  %v2883_v40 = vld [vmem:[%s3082_s23 + $0x30] sm:$0xff]  }
 0x635   : > { %2739 = vmatprep.subr.bf16.mxu1 %v2947_v3 }
 0x638   : > { %2740 = vmatpush3.bf16.msra.mxu1 %v2876_v42 }
 0x639   : > { %2753 = vmatprep.subr.bf16.mxu1 %v2947_v3 }
 0x63b   : > { %2742 = vmatmul.mubr.msk.bf16.vlgmr.msra.gmra.mrb[24].mxu1 %vm742_vm2, %v3153_v8 }
 0x63c   : > { %2755 = vmatprep.mubr.msk.bf16.mxu1 %vm2948_vm1, %v2947_v3 }
 0x6fe   : > { %v1321_v43 = vpop.f32.mrb[16].mxu1 }
 0x6ff   : > { %v1327_v45 = vpack.c.bf16 %v1321_v43, %v1321_v43  ;;  %v2715_v46 = vpop.f32.mrb[17].mxu1  ;;  %v2881_v43 = vld [vmem:[%s3087_s13 + $0x30] sm:$0xff]  }
 0x700   : > { %v1324_v47 = vpop.f32.mrb[18].mxu1 }
 0x701   : > { %v2716_v48 = vpop.f32.mrb[19].mxu1  ;;  %2720 = vmatmul.mubr.msk.bf16.vlgmr.msra.gmra.mrb[20].mxu0 %vm914_vm3, %v1327_v45 }
 0x702   : > { %2730 = vmatpush3.bf16.msra.mxu0 %v2877_v44  ;;  %2733 = vmatprep.mubr.msk.bf16.mxu0 %vm2948_vm1, %v2947_v3  ;;  %v2882_v48 = vld [vmem:[%s3087_s13 + $0x38] sm:$0xff]  }
 0x703   : > { %2731 = vmatprep.subr.bf16.mxu0 %v2947_v3 }
 0x706   : > { %v1416_v50 = vpop.f32.mrb[20].mxu1  ;;  %2732 = vmatpush3.bf16.msra.mxu0 %v2878_v49 }
 0x707   : > { %v2727_v51 = vpop.f32.mrb[21].mxu1  ;;  %2745 = vmatprep.subr.bf16.mxu0 %v2947_v3 }
 0x708   : > { %v1419_v52 = vpop.f32.mrb[22].mxu1 }
 0x709   : > { %v2728_v53 = vpop.f32.mrb[23].mxu1  ;;  %2734 = vmatmul.mubr.msk.bf16.vlgmr.msra.gmra.mrb[24].mxu0 %vm742_vm2, %v3153_v8 }
 0x70a   : > { %2749 = vmatprep.mubr.msk.bf16.mxu0 %vm2948_vm1, %v2947_v3  ;;  %2746 = vmatpush3.bf16.msra.mxu0 %v2879_v13 }
 0x70b   : > { %2747 = vmatprep.subr.bf16.mxu0 %v2947_v3 }
 0x70e   : > { %v1546_v55 = vpop.f32.mrb[24].mxu1  ;;  %2748 = vmatpush3.bf16.msra.mxu0 %v2880_v14 }
 0x70f   : > { %v1547_v56 = vadd.f32 %v2519_v54, %v1546_v55  ;;  %v2743_v57 = vpop.f32.mrb[25].mxu1  ;;  %2759 = vmatprep.subr.bf16.mxu0 %v2947_v3 }
 0x710   : > { %v1549_v58 = vpop.f32.mrb[26].mxu1 }
 0x711   : > { %v1618_v59 = vpack.c.bf16 %v1547_v56, %v1547_v56  ;;  %v2744_v60 = vpop.f32.mrb[27].mxu1  ;;  %2750 = vmatmul.mubr.msk.bf16.vlgmr.msra.gmra.mrb[28].mxu0 %vm742_vm2, %v3153_v8  ;;  %v2550_v58 = vld [vmem:[%s3103_s25 + $0x3] ss:$0 sm:$0xff]  ;;  %s3438_s25 = sld [smem:[#allocation19_spill]] (!%p2574_p8) }
 0x712   : > { %2761 = vmatprep.mubr.msk.bf16.mxu0 %vm2948_vm1, %v2947_v3 }
 0x713   : > { %v1623_v61 = vsel %vm914_vm3, %v1618_v59, 0 }
 0x714   : > { %2754 = vmatpush3.bf16.xpose.msra.mxu1 %v1623_v61 }
 0x715   : > { %2765 = vmatprep.subr.bf16.mxu1 %v2947_v3 }
 0x7d4   : > { %v1370_v62 = vpop.f32.mrb[20].mxu0 }
 0x7d5   : > { %v3263_v63 = vadd.f32 %v1416_v50, %v1370_v62  ;;  %v2721_v0 = vpop.f32.mrb[21].mxu0 }
 0x7d6   : > { %v1373_v1 = vpop.f32.mrb[22].mxu0  ;;  %v2541_v0 = vld [vmem:[%s3098_s27 + $0x3] ss:$0 sm:$0xff] }
 0x7d7   : > { %v2722_v2 = vpop.f32.mrb[23].mxu0 }
 0x7dc   : > { %v1481_v5 = vpop.f32.mrb[24].mxu0 }
 0x7dd   : > { %v1482_v7 = vadd.f32 %v2510_v4, %v1481_v5  ;;  %v2735_v9 = vpop.f32.mrb[25].mxu0 }
 0x7de   : > { %v1484_v10 = vpop.f32.mrb[26].mxu0  ;;  %v2886_v9 = vld [vmem:[%s3092_s29 + $0x38] sm:$0xff]  }
 0x7df   : > { %v1617_v11 = vpack.c.bf16 %v1482_v7, %v1482_v7  ;;  %v2736_v12 = vpop.f32.mrb[27].mxu0  ;;  %v2885_v7 = vld [vmem:[%s3092_s29 + $0x30] sm:$0xff]  }
 0x7e1   : > { %2756 = vmatmul.mubr.msk.bf16.vlgmr.msra.gmra.mrb[28].mxu1 %vm914_vm3, %v1617_v11 }
 0x7e2   : > { %2767 = vmatprep.mubr.msk.bf16.mxu1 %vm2948_vm1, %v2947_v3  ;;  %2766 = vmatpush3.bf16.msra.mxu1 %v1732_v35 }
 0x7e3   : > { %2779 = vmatprep.subr.bf16.mxu1 %v2947_v3 }
 0x7e4   : > { %v1611_v26 = vpop.f32.mrb[28].mxu0 }
 0x7e5   : > { %v2751_v27 = vpop.f32.mrb[29].mxu0  ;;  %v1612_v31 = vadd.f32 %v2528_v29, %v1611_v26 }
 0x7e6   : > { %v1614_v28 = vpop.f32.mrb[30].mxu0 }
 0x7e7   : > { %v2752_v30 = vpop.f32.mrb[31].mxu0  ;;  %v1678_v32 = vpack.c.bf16 %v1612_v31, %v1612_v31  ;;  %v2565_v28 = vld [vmem:[%s3114_s28 + $0xc] sm:$0xf] }
 0x7e8   : > { %v2085_v29 = vsel %vm978_vm4, %v2565_v28, 0 }
 0x7e9   : > { %v1683_v33 = vsel %vm978_vm4, %v1678_v32, 0 }
 0x7ea   : > { %2760 = vmatpush3.bf16.msra.mxu0 %v1683_v33 }
 0x7eb   : > { %2771 = vmatprep.subr.bf16.mxu0 %v2947_v3 }
 0x8b4   : > { %v1659_v15 = vpop.f32.mrb[28].mxu1 }
 0x8b5   : > { %v1665_v16 = vmul.f32 0.35355338, %v1659_v15  ;;  %v2757_v17 = vpop.f32.mrb[29].mxu1 }
 0x8b6   : > { %v1662_v18 = vpop.f32.mrb[30].mxu1 }
 0x8b7   : > { %v2758_v19 = vpop.f32.mrb[31].mxu1  ;;  %v1666_v20 = vsel %vm914_vm3, %v1665_v16, -inf }
 0x8b8   : > { %1667 = vmax.xlane.f32.xlu0 %v1666_v20 }
 0x945   : > { %v1668_v21 = vpop.xlane.xlu0 %1667 }
 0x946   : > { %v1669_v22 = vsub.f32 %v1665_v16, %v1668_v21 }
 0x948   : > { %v1670_v23 = vmul.f32 1.442695, %v1669_v22 }
 0x94a   : > { %2897 = vpow2.f32 %v1670_v23  ;;  %v2559_v23 = vld [vmem:[%s3108_s24 + $0x3] ss:$0 sm:$0xff]  ;;  %s3439_s24 = sld [smem:[#allocation10_spill]] (!%p2574_p8) }
 0x950   : > { %s3441_s28 = scalar_lea.vmem (!%p2574_p8), %s3440_s26, %s3439_s24 }
 0x954   : > { %v2898_v24 = vpop.eup %2897 }
 0x955   : > { %v1672_v25 = vsel %vm914_vm3, %v2898_v24, 0.0 }
 0x956   : > { %1673 = vadd.xlane.f32.xlu1 %v1672_v25 }
 0x9e3   : > { %v1674_v36 = vpop.xlane.xlu1 %1673 }
 0x9e4   : > { %2899 = vrcp.f32 %v1674_v36 }
 0x9ee   : > { %v2900_v37 = vpop.eup %2899 }
 0x9ef   : > { %v1676_v38 = vmul.f32 %v2900_v37, %v2898_v24 }
 0x9f1   : > { %v1677_v39 = vpack.c.bf16 %v1676_v38, %v1676_v38 }
 0x9f3   : > { %2762 = vmatmul.mubr.msk.bf16.vlgmr.msra.gmra.mrb[32].mxu0 %vm914_vm3, %v1677_v39  ;;  %v2887_v39 = vld [vmem:[%s3123_s0] sm:$0xff]  }
 0x9f4   : > { %2775 = vmatprep.mubr.msk.bf16.mxu0 %vm2948_vm1, %v2947_v3  ;;  %2772 = vmatpush3.bf16.msra.mxu0 %v2883_v40  ;;  %v2888_v40 = vld [vmem:[%s3123_s0 + $0x8] sm:$0xff]  }
 0x9f5   : > { %2773 = vmatprep.subr.bf16.mxu0 %v2947_v3 }
 0x9f8   : > { %2774 = vmatpush3.bf16.msra.mxu0 %v2884_v41 }
 0x9f9   : > { %2787 = vmatprep.subr.bf16.mxu0 %v2947_v3 }
 0x9fb   : > { %2776 = vmatmul.mubr.msk.bf16.vlgmr.msra.gmra.mrb[36].mxu0 %vm742_vm2, %v3153_v8 }
 0x9fc   : > { %2791 = vmatprep.mubr.msk.bf16.mxu0 %vm2948_vm1, %v2947_v3  ;;  %2788 = vmatpush3.bf16.msra.mxu0 %v2885_v7  ;;  %v2239_v7 = vld [vmem:[%s3438_s25] sm:$0x1] (!%p2574_p8) }
 0x9fd   : > { %2789 = vmatprep.subr.bf16.mxu0 %v2947_v3 }
 0xa00   : > { %2790 = vmatpush3.bf16.msra.mxu0 %v2886_v9 }
 0xa01   : > { %2801 = vmatprep.subr.bf16.mxu0 %v2947_v3 }
 0xa03   : > { %2792 = vmatmul.mubr.msk.bf16.vlgmr.msra.gmra.mrb[40].mxu0 %vm742_vm2, %v3153_v8 }
 0xa04   : > { %2803 = vmatprep.mubr.msk.bf16.mxu0 %vm2948_vm1, %v2947_v3 }
 0xac6   : > { %v1719_v42 = vpop.f32.mrb[32].mxu0 }
 0xac7   : > { %v1725_v44 = vpack.c.bf16 %v1719_v42, %v1719_v42  ;;  %v2763_v45 = vpop.f32.mrb[33].mxu0  ;;  %v2567_v42 = vld [vmem:[%s691_s17] ss:$0 sm:$0xff] }
 0xac8   : > { %v1722_v46 = vpop.f32.mrb[34].mxu0 }
 0xac9   : > { %v2764_v47 = vpop.f32.mrb[35].mxu0  ;;  %2768 = vmatmul.mubr.msk.bf16.vlgmr.msra.gmra.mrb[32].mxu1 %vm914_vm3, %v1725_v44 }
 0xaca   : > { %2780 = vmatpush3.bf16.msra.mxu1 %v2881_v43  ;;  %2783 = vmatprep.mubr.msk.bf16.mxu1 %vm2948_vm1, %v2947_v3 }
 0xacb   : > { %2781 = vmatprep.subr.bf16.mxu1 %v2947_v3 }
 0xace   : > { %2782 = vmatpush3.bf16.msra.mxu1 %v2882_v48  ;;  %v1834_v49 = vpop.f32.mrb[36].mxu0 }
 0xacf   : > { %2795 = vmatprep.subr.bf16.mxu1 %v2947_v3  ;;  %v2777_v50 = vpop.f32.mrb[37].mxu0  ;;  %v1835_v5 = vadd.f32 %v2541_v0, %v1834_v49 }
 0xad0   : > { %v1837_v51 = vpop.f32.mrb[38].mxu0 }
 0xad1   : > { %2784 = vmatmul.mubr.msk.bf16.vlgmr.msra.gmra.mrb[36].mxu1 %vm742_vm2, %v3153_v8  ;;  %v2778_v52 = vpop.f32.mrb[39].mxu0 }
 0xad2   : > { %2797 = vmatprep.mubr.msk.bf16.mxu1 %vm2948_vm1, %v2947_v3 }
 0xad6   : > { %v1964_v20 = vpop.f32.mrb[40].mxu0 }
 0xad7   : > { %v2793_v21 = vpop.f32.mrb[41].mxu0  ;;  %v1965_v25 = vadd.f32 %v2559_v23, %v1964_v20 }
 0xad8   : > { %v1967_v22 = vpop.f32.mrb[42].mxu0 }
 0xad9   : > { %v2794_v24 = vpop.f32.mrb[43].mxu0  ;;  %v2031_v26 = vpack.c.bf16 %v1965_v25, %v1965_v25 }
 0xadb   : > { %v2036_v27 = vsel %vm978_vm4, %v2031_v26, 0 }
 0xadc   : > { %2802 = vmatpush3.bf16.msra.mxu0 %v2036_v27 }
 0xadd   : > { %2813 = vmatprep.subr.bf16.mxu0 %v2947_v3 }
 0xb9c   : > { %v1768_v53 = vpop.f32.mrb[32].mxu1 }
 0xb9d   : > { %v3308_v54 = vadd.f32 %v1768_v53, %v3263_v63  ;;  %v2769_v55 = vpop.f32.mrb[33].mxu1  ;;  %v1970_v63 = vpack.c.bf16 %v1835_v5, %v1835_v5 }
 0xb9e   : > { %v1771_v56 = vpop.f32.mrb[34].mxu1 }
 0xb9f   : > { %v2770_v57 = vpop.f32.mrb[35].mxu1 }
 0xba4   : > { %v1899_v59 = vpop.f32.mrb[36].mxu1 }
 0xba5   : > { %v1900_v60 = vadd.f32 %v2550_v58, %v1899_v59  ;;  %v2785_v61 = vpop.f32.mrb[37].mxu1 }
 0xba6   : > { %v1902_v62 = vpop.f32.mrb[38].mxu1 }
 0xba7   : > { %v1971_v1 = vpack.c.bf16 %v1900_v60, %v1900_v60  ;;  %v2786_v2 = vpop.f32.mrb[39].mxu1 }
 0xba9   : > { %v1976_v4 = vsel %vm914_vm3, %v1971_v1, 0 }
 0xbaa   : > { %2796 = vmatpush3.bf16.xpose.msra.mxu1 %v1976_v4  ;;  %v2573_v4 = vld [vmem:[%s705_s7] ss:$0 sm:$0xff] }
 0xbab   : > { %2807 = vmatprep.subr.bf16.mxu1 %v2947_v3 }
 0xbb1   : > { %2798 = vmatmul.mubr.msk.bf16.vlgmr.msra.gmra.mrb[40].mxu1 %vm914_vm3, %v1970_v63 }
 0xbb2   : > { %2809 = vmatprep.mubr.msk.bf16.mxu1 %vm2948_vm1, %v2947_v3  ;;  %2808 = vmatpush3.bf16.msra.mxu1 %v2085_v29 }
 0xc84   : > { %v2012_v10 = vpop.f32.mrb[40].mxu1 }
 0xc85   : > { %v2018_v11 = vmul.f32 0.35355338, %v2012_v10  ;;  %v2799_v12 = vpop.f32.mrb[41].mxu1 }
 0xc86   : > { %v2015_v13 = vpop.f32.mrb[42].mxu1 }
 0xc87   : > { %v2800_v14 = vpop.f32.mrb[43].mxu1  ;;  %v2019_v15 = vsel %vm914_vm3, %v2018_v11, -inf }
 0xc88   : > { %2020 = vmax.xlane.f32.xlu0 %v2019_v15 }
 0xd15   : > { %v2021_v16 = vpop.xlane.xlu0 %2020 }
 0xd16   : > { %v2022_v17 = vsub.f32 %v2018_v11, %v2021_v16  ;;  %v2245_v11 = vld [vmem:[#allocation3] sm:$0x1] (!%p2574_p8) }
 0xd18   : > { %v2023_v18 = vmul.f32 1.442695, %v2022_v17 }
 0xd1a   : > { %2901 = vpow2.f32 %v2023_v18 }
 0xd24   : > { %v2902_v19 = vpop.eup %2901 }
 0xd25   : > { %v2025_v8 = vsel %vm914_vm3, %v2902_v19, 0.0 }
 0xd26   : > { %2026 = vadd.xlane.f32.xlu1 %v2025_v8 }
 0xdb3   : > { %v2027_v30 = vpop.xlane.xlu1 %2026 }
 0xdb4   : > { %2903 = vrcp.f32 %v2027_v30 }
 0xdbe   : > { %v2904_v31 = vpop.eup %2903 }
 0xdbf   : > { %v2029_v32 = vmul.f32 %v2904_v31, %v2902_v19 }
 0xdc1   : > { %v2030_v33 = vpack.c.bf16 %v2029_v32, %v2029_v32 }
 0xdc3   : > { %2804 = vmatmul.mubr.msk.bf16.vlgmr.msra.gmra.mrb[44].mxu0 %vm914_vm3, %v2030_v33 }
 0xdc4   : > { %2817 = vmatprep.mubr.msk.bf16.mxu0 %vm2948_vm1, %v2947_v3  ;;  %2814 = vmatpush3.bf16.msra.mxu0 %v2887_v39 }
 0xdc5   : > { %2815 = vmatprep.subr.bf16.mxu0 %v2947_v3  ;;  %v2568_v3 = vld [vmem:[%s699_s1] ss:$0 sm:$0xff] }
 0xdc8   : > { %2816 = vmatpush3.bf16.msra.mxu0 %v2888_v40 }
 0xe96   : > { %v2072_v34 = vpop.f32.mrb[44].mxu0 }
 0xe97   : > { %v2078_v35 = vpack.c.bf16 %v2072_v34, %v2072_v34  ;;  %v2805_v36 = vpop.f32.mrb[45].mxu0 }
 0xe98   : > { %v2075_v37 = vpop.f32.mrb[46].mxu0 }
 0xe99   : > { %v2806_v38 = vpop.f32.mrb[47].mxu0  ;;  %2810 = vmatmul.mubr.msk.bf16.vlgmr.msra.gmra.mrb[44].mxu1 %vm914_vm3, %v2078_v35 }
 0xf6c   : > { %v2121_v41 = vpop.f32.mrb[44].mxu1 }
 0xf6d   : > { %v2127_v43 = vadd.f32 %v2121_v41, %v3308_v54  ;;  %v2811_v44 = vpop.f32.mrb[45].mxu1 }
 0xf6e   : > { %v2124_v45 = vpop.f32.mrb[46].mxu1 }
 0xf6f   : > { %v2135_v46 = vadd.f32 %v2567_v42, %v2127_v43  ;;  %v2812_v47 = vpop.f32.mrb[47].mxu1 }
 0xf71   : > { %v2136_v48 = vpack.c.bf16 %v2135_v46, %v2135_v46 }
 0xf73   : > { %2818 = vmatmul.mubr.msk.bf16.vlgmr.msra.gmra.mrb[48].mxu0 %vm742_vm2, %v2136_v48 }
0x1046   : > { %v2197_v49 = vpop.f32.mrb[48].mxu0 }
0x1047   : > { %v2198_v50 = vadd.f32 %v2568_v3, %v2197_v49  ;;  %v2819_v51 = vpop.f32.mrb[49].mxu0 }
0x1048   : > { %v2200_v52 = vpop.f32.mrb[50].mxu0 }
0x1049   : > { %v2820_v53 = vpop.f32.mrb[51].mxu0  ;;  %v2203_v54 = vadd.f32 %v2198_v50, %v3146_v6  ;;  %v2572_v6 = vld [vmem:[%s702_s6] ss:$0 sm:$0xff] }
0x104b   : > { %v2204_v55 = vsel %vm742_vm2, %v2203_v54, 0.0 }
0x104c   : > { %2205 = vadd.xlane.f32.xlu0 %v2204_v55 }
0x10d9   : > { %v2206_v56 = vpop.xlane.xlu0 %2205 }
0x10da   : > { %v2208_v57 = vmul.f32 0.03125, %v2206_v56 }
0x10dc   : > { %v2209_v58 = vsub.f32 %v2203_v54, %v2208_v57 }
0x10de   : > { %v2210_v59 = vmul.f32 %v2209_v58, %v2209_v58 }
0x10e0   : > { %v2211_v60 = vsel %vm742_vm2, %v2210_v59, 0.0 }
0x10e1   : > { %2212 = vadd.xlane.f32.xlu1 %v2211_v60 }
0x116e   : > { %v2213_v61 = vpop.xlane.xlu1 %2212 }
0x116f   : > { %v2214_v62 = vmul.f32 0.03125, %v2213_v61 }
0x1171   : > { %v2215_v0 = vadd.f32 1e-05, %v2214_v62 }
0x1173   : > { %2905 = vrsqrt.f32 %v2215_v0 }
0x117d   : > { %v2906_v1 = vpop.eup %2905 }
0x117e   : > { %v2217_v2 = vmul.f32 %v2906_v1, %v2209_v58  ;;  %2238 = sbr.rel (%p2574_p8) target bundleno = 4632 (0x1218), region = 88 }
0x1180   : > { %v2225_v5 = vmul.f32 %v2572_v6, %v2217_v2 }
0x1182   : > { %v2233_v63 = vadd.f32 %v2573_v4, %v2225_v5 }
0x1184   : > { %2234 = vst.msk [vmem:[#allocation2] sm:$0xff] %vm742_vm2, %v2233_v63  ;;  %v2240_v9 = vmul.f32 (!%p2574_p8), %v2239_v7, %v2233_v63 }
0x1186   : > { %v2242_v10 = vsel %vm2241_vm5, %v2240_v9, 0.0 }
0x1187   : > { %2243 = vadd.xlane.f32.xlu0 %v2242_v10 }
0x1214   : > { %v2244_v12 = vpop.xlane.xlu0 %2243 }
0x1215   : > { %v2246_v13 = vadd.f32 %v2245_v11, %v2244_v12 }
0x1217   : > { %2248 = vst.msk [vmem:[%s3441_s28] sm:$0x1] %vm2247_vm6, %v2246_v13 }
0x1218 PF: > { %s3442_s16 = sld [smem:[#allocation7_spill]]  ;;  %s3443_s20 = sld [smem:[#allocation5_spill]] }
0x1219   : > { %s3444_s21 = sld [smem:[#allocation6_spill]]  ;;  %s3445_s22 = sld [smem:[#allocation8_spill]] }
0x121a   : > { %s3446_s23 = sld [smem:[#allocation9_spill]] }
0x121e   : > { %s27_s24 = sadd.s32 1, %s3442_s16  }
0x121f   : > { %p24_p9 = scmp.ge.s32.totalorder %s27_s24, 8  }
0x1221   :  { %26 = sbr.rel (!%p24_p9) target bundleno = 11 (0xb), region = 175 }

</bundles_post_ra>
